<compile_context>
chip_gen: v5e
topology: v5e:2x2
jax: 0.10.0
libtpu: 0.0.40
codegen_flags: <defaults>
</compile_context>

<pallas_src>
import functools

import jax
import jax.numpy as jnp
from jax.experimental import pallas as pl
from jax.experimental.pallas import tpu as pltpu

_LANE = 128


def _round_up(x, m):
    return ((x + m - 1) // m) * m


def _pad2(a, rows, cols):
    pr, pc = rows - a.shape[0], cols - a.shape[1]
    if pr or pc:
        a = jnp.pad(a, ((0, pr), (0, pc)))
    return a


def _mlp_kernel(layer_num, skips, x_ref, *refs):
    """Whole-MLP forward for one tile of tokens.

    refs = (w0, b0, w1, b1, ..., w_{L-1}, b_{L-1}, out_ref)
    """
    out_ref = refs[-1]
    params = refs[:-1]

    x = x_ref[...].astype(jnp.float32)
    h = x
    for i in range(layer_num):
        w = params[2 * i][...]
        b = params[2 * i + 1][...].astype(jnp.float32)   # (1, out_pad) broadcasts
        lhs = h if w.dtype == jnp.float32 else h.astype(w.dtype)
        h = jnp.dot(lhs, w, preferred_element_type=jnp.float32) + b
        if skips is not None and i in skips:
            h = h + x
            if i < layer_num - 1:
                h = jnp.maximum(h, 0.0)
            x = h
        elif i < layer_num - 1:
            h = jnp.maximum(h, 0.0)
    out_ref[...] = h.astype(out_ref.dtype)


def mlp_pallas(x, weights, biases, skips=None, tile_n=None, use_bf16=True,
               vmem_budget_bytes=40 * 1024 * 1024):
    """x: (N, in_features); weights[i]: (in_ch_i, out_ch_i); biases[i]: (1, out_ch_i)."""
    layer_num = len(weights)
    n, in_features = x.shape
    out_features = weights[-1].shape[1]
    skips_t = tuple(sorted(skips)) if skips is not None else None

    # Skip connections need h and the running x to have matching widths.
    if skips_t is not None:
        ref_dim = in_features
        for i in range(layer_num):
            if i in skips_t:
                assert weights[i].shape[1] == ref_dim, \
                    "skip layer requires out_ch == running input dim"
                ref_dim = weights[i].shape[1]

    # --- pad feature dims to lane multiples (zero padding => dead lanes stay 0)
    dims = [in_features] + [w.shape[1] for w in weights]
    pdims = [_round_up(d, _LANE) for d in dims]
    in_pad, out_pad = pdims[0], pdims[-1]

    wdt = jnp.bfloat16 if use_bf16 else jnp.float32
    w_pad, b_pad = [], []
    for i, (w, b) in enumerate(zip(weights, biases)):
        w_pad.append(_pad2(w.astype(jnp.float32), pdims[i], pdims[i + 1]).astype(wdt))
        b_pad.append(_pad2(b.reshape(1, -1).astype(jnp.float32), 1, pdims[i + 1]))

    # --- pick tile_n from an explicit VMEM budget (conservative for v7x 64 MiB)
    wbytes = sum(int(p.size) * p.dtype.itemsize for p in w_pad)
    bbytes = sum(int(p.size) * p.dtype.itemsize for p in b_pad)
    fixed = 2 * (wbytes + bbytes)            # worst case: weights double-buffered
    max_act = max(pdims)
    if tile_n is None:
        tile_n = 128
        for cand in (2048, 1024, 512, 256, 128):
            stream = (2 * cand * in_pad * x.dtype.itemsize       # x  (double-buffered)
                      + 2 * cand * out_pad * x.dtype.itemsize    # out (double-buffered)
                      + 4 * cand * max_act * 4)                  # live f32 activations
            if fixed + stream <= vmem_budget_bytes:
                tile_n = cand
                break
        # keep enough grid steps for pipelining / the two TensorCores on v7x
        while tile_n > 256 and pl.cdiv(n, tile_n) < 4:
            tile_n //= 2
    tile_n = max(8, _round_up(tile_n, 8))

    n_pad = _round_up(n, tile_n)
    grid = (n_pad // tile_n,)

    kernel = functools.partial(_mlp_kernel, layer_num, skips_t)

    flops = 2 * n_pad * sum(pdims[i] * pdims[i + 1] for i in range(layer_num))
    bytes_accessed = (n_pad * in_pad * x.dtype.itemsize
                      + wbytes + bbytes
                      + n_pad * out_pad * x.dtype.itemsize)
    cost = pl.CostEstimate(flops=flops, transcendentals=0,
                           bytes_accessed=bytes_accessed)

    def make_call(single_buffer_weights):
        in_specs = [pl.BlockSpec((tile_n, in_pad), lambda i: (i, 0))]
        for wp, bp in zip(w_pad, b_pad):
            if single_buffer_weights:
                in_specs.append(pl.BlockSpec(wp.shape, lambda i: (0, 0),
                                             pipeline_mode=pl.Buffered(1)))
                in_specs.append(pl.BlockSpec(bp.shape, lambda i: (0, 0),
                                             pipeline_mode=pl.Buffered(1)))
            else:
                in_specs.append(pl.BlockSpec(wp.shape, lambda i: (0, 0)))
                in_specs.append(pl.BlockSpec(bp.shape, lambda i: (0, 0)))
        out_spec = pl.BlockSpec((tile_n, out_pad), lambda i: (i, 0))

        return pl.pallas_call(
            kernel,
            out_shape=jax.ShapeDtypeStruct((n_pad, out_pad), x.dtype),
            grid_spec=pltpu.PrefetchScalarGridSpec(
                num_scalar_prefetch=0,
                grid=grid,
                in_specs=in_specs,
                out_specs=out_spec,
            ),
            compiler_params=pltpu.CompilerParams(
                dimension_semantics=("parallel",),
                vmem_limit_bytes=48 * 1024 * 1024,   # fits v7x's 64 MiB/TC VMEM
            ),
            cost_estimate=cost,
        )

    def run(call):
        @jax.jit
        def fwd(xx, w_list, b_list):
            x_p = jnp.pad(xx, ((0, n_pad - n), (0, in_pad - in_features)))
            params = []
            for wp, bp in zip(w_list, b_list):
                params.extend([wp, bp])
            out_p = call(x_p, *params)
            return out_p[:n, :out_features]
        return fwd(x, w_pad, b_pad)

    try:
        return run(make_call(single_buffer_weights=True))
    except Exception:
        # Fallback for JAX versions that reject Buffered(1) single-buffering.
        return run(make_call(single_buffer_weights=False))


def mlp_reference(x, weights, biases, skips=None):
    """Pure-JAX reference matching the PyTorch forward semantics."""
    layer_num = len(weights)
    h = x
    xx = x
    for i, (w, b) in enumerate(zip(weights, biases)):
        h = h @ w + b
        if skips is not None:
            if i in skips:
                h = h + xx
                if i < layer_num - 1:
                    h = jax.nn.relu(h)
                xx = h
            elif i < layer_num - 1:
                h = jax.nn.relu(h)
        elif i < layer_num - 1:
            h = jax.nn.relu(h)
    return h


def init_mlp_params(key, in_features, hidden_features, out_features, layer_num):
    """Deterministic nn.Linear-style init (uniform(-1/sqrt(in), 1/sqrt(in)))."""
    weights, biases = [], []
    for i in range(layer_num):
        in_ch = in_features if i == 0 else hidden_features
        out_ch = out_features if i == layer_num - 1 else hidden_features
        key, kw, kb = jax.random.split(key, 3)
        bound = 1.0 / jnp.sqrt(jnp.float32(in_ch))
        weights.append(jax.random.uniform(kw, (in_ch, out_ch), jnp.float32, -bound, bound))
        biases.append(jax.random.uniform(kb, (1, out_ch), jnp.float32, -bound, bound))
    return weights, biases


if __name__ == "__main__":
    # Small shapes consistent with the module; the skip layer requires
    # hidden_features == in_features.  Token count deliberately not a multiple
    # of the tile to exercise the padding path.
    in_features = 32
    hidden_features = 32
    out_features = 16
    layer_num = 4
    skips = (1,)
    n_tokens = 1000

    key = jax.random.PRNGKey(0)
    key, kx = jax.random.split(key)
    x = jax.random.normal(kx, (n_tokens, in_features), jnp.float32)
    weights, biases = init_mlp_params(key, in_features, hidden_features,
                                      out_features, layer_num)

    ref = mlp_reference(x, weights, biases, skips=skips)

    # Exact-precision path (f32 MXU operands) — tight tolerance.
    out_f32 = mlp_pallas(x, weights, biases, skips=skips, use_bf16=False)
    out_f32 = jax.block_until_ready(out_f32)
    assert out_f32.shape == (n_tokens, out_features)
    assert jnp.allclose(out_f32, ref, atol=1e-4, rtol=1e-4), "f32 mismatch vs reference"

    # Fast path (bf16 MXU operands, f32 accumulation/elementwise) — loose tolerance.
    out_bf16 = mlp_pallas(x, weights, biases, skips=skips, use_bf16=True)
    out_bf16 = jax.block_until_ready(out_bf16)
    assert out_bf16.shape == (n_tokens, out_features)
    assert jnp.allclose(out_bf16, ref, atol=5e-2, rtol=5e-2), "bf16 mismatch vs reference"

    print("KERNEL_OK")
</pallas_src>

<mosaic_0001>
module attributes {stable_mosaic.version = 11 : i64} {
  func.func @_mlp_kernel(%arg0: i32, %arg1: memref<256x128xf32, #tpu.memory_space<vmem>>, %arg2: memref<128x128xf32, #tpu.memory_space<vmem>>, %arg3: memref<1x128xf32, #tpu.memory_space<vmem>>, %arg4: memref<128x128xf32, #tpu.memory_space<vmem>>, %arg5: memref<1x128xf32, #tpu.memory_space<vmem>>, %arg6: memref<128x128xf32, #tpu.memory_space<vmem>>, %arg7: memref<1x128xf32, #tpu.memory_space<vmem>>, %arg8: memref<128x128xf32, #tpu.memory_space<vmem>>, %arg9: memref<1x128xf32, #tpu.memory_space<vmem>>, %arg10: memref<256x128xf32, #tpu.memory_space<vmem>>) attributes {dimension_semantics = [#tpu.dimension_semantics<parallel>], iteration_bounds = array<i64: 4>, scalar_prefetch = 0 : i64, scratch_operands = 0 : i64, tpu.core_type = #tpu.core_type<tc>, window_params = [{transform_indices = @transform_0, window_bounds = array<i64: 256, 128>}, {pipeline_mode = #tpu.pipeline_mode<synchronous>, transform_indices = @transform_1, window_bounds = array<i64: 128, 128>}, {pipeline_mode = #tpu.pipeline_mode<synchronous>, transform_indices = @transform_2, window_bounds = array<i64: 1, 128>}, {pipeline_mode = #tpu.pipeline_mode<synchronous>, transform_indices = @transform_3, window_bounds = array<i64: 128, 128>}, {pipeline_mode = #tpu.pipeline_mode<synchronous>, transform_indices = @transform_4, window_bounds = array<i64: 1, 128>}, {pipeline_mode = #tpu.pipeline_mode<synchronous>, transform_indices = @transform_5, window_bounds = array<i64: 128, 128>}, {pipeline_mode = #tpu.pipeline_mode<synchronous>, transform_indices = @transform_6, window_bounds = array<i64: 1, 128>}, {pipeline_mode = #tpu.pipeline_mode<synchronous>, transform_indices = @transform_7, window_bounds = array<i64: 128, 128>}, {pipeline_mode = #tpu.pipeline_mode<synchronous>, transform_indices = @transform_8, window_bounds = array<i64: 1, 128>}, {transform_indices = @transform_9, window_bounds = array<i64: 256, 128>}]} {
    %c0 = arith.constant 0 : index
    %c0_0 = arith.constant 0 : index
    %0 = vector.load %arg1[%c0, %c0_0] : memref<256x128xf32, #tpu.memory_space<vmem>>, vector<256x128xf32>
    %c0_1 = arith.constant 0 : index
    %c0_2 = arith.constant 0 : index
    %1 = vector.load %arg2[%c0_1, %c0_2] : memref<128x128xf32, #tpu.memory_space<vmem>>, vector<128x128xf32>
    %c0_3 = arith.constant 0 : index
    %c0_4 = arith.constant 0 : index
    %2 = vector.load %arg3[%c0_3, %c0_4] : memref<1x128xf32, #tpu.memory_space<vmem>>, vector<1x128xf32>
    %cst = arith.constant dense<0.000000e+00> : vector<256x128xf32>
    %3 = tpu.matmul %0, %1, %cst {dimension_numbers = #tpu.dot_dimension_numbers<[1], [0], [0], [1], [0, 0, 1, 1], [], []>} : vector<256x128xf32>, vector<128x128xf32>, vector<256x128xf32> -> vector<256x128xf32>
    %4 = vector.broadcast %2 : vector<1x128xf32> to vector<256x128xf32>
    %5 = arith.addf %3, %4 : vector<256x128xf32>
    %cst_5 = arith.constant 0.000000e+00 : f32
    %6 = vector.broadcast %cst_5 : f32 to vector<256x128xf32>
    %7 = arith.maximumf %5, %6 : vector<256x128xf32>
    %c0_6 = arith.constant 0 : index
    %c0_7 = arith.constant 0 : index
    %8 = vector.load %arg4[%c0_6, %c0_7] : memref<128x128xf32, #tpu.memory_space<vmem>>, vector<128x128xf32>
    %c0_8 = arith.constant 0 : index
    %c0_9 = arith.constant 0 : index
    %9 = vector.load %arg5[%c0_8, %c0_9] : memref<1x128xf32, #tpu.memory_space<vmem>>, vector<1x128xf32>
    %cst_10 = arith.constant dense<0.000000e+00> : vector<256x128xf32>
    %10 = tpu.matmul %7, %8, %cst_10 {dimension_numbers = #tpu.dot_dimension_numbers<[1], [0], [0], [1], [0, 0, 1, 1], [], []>} : vector<256x128xf32>, vector<128x128xf32>, vector<256x128xf32> -> vector<256x128xf32>
    %11 = vector.broadcast %9 : vector<1x128xf32> to vector<256x128xf32>
    %12 = arith.addf %10, %11 : vector<256x128xf32>
    %13 = arith.addf %12, %0 : vector<256x128xf32>
    %cst_11 = arith.constant 0.000000e+00 : f32
    %14 = vector.broadcast %cst_11 : f32 to vector<256x128xf32>
    %15 = arith.maximumf %13, %14 : vector<256x128xf32>
    %c0_12 = arith.constant 0 : index
    %c0_13 = arith.constant 0 : index
    %16 = vector.load %arg6[%c0_12, %c0_13] : memref<128x128xf32, #tpu.memory_space<vmem>>, vector<128x128xf32>
    %c0_14 = arith.constant 0 : index
    %c0_15 = arith.constant 0 : index
    %17 = vector.load %arg7[%c0_14, %c0_15] : memref<1x128xf32, #tpu.memory_space<vmem>>, vector<1x128xf32>
    %cst_16 = arith.constant dense<0.000000e+00> : vector<256x128xf32>
    %18 = tpu.matmul %15, %16, %cst_16 {dimension_numbers = #tpu.dot_dimension_numbers<[1], [0], [0], [1], [0, 0, 1, 1], [], []>} : vector<256x128xf32>, vector<128x128xf32>, vector<256x128xf32> -> vector<256x128xf32>
    %19 = vector.broadcast %17 : vector<1x128xf32> to vector<256x128xf32>
    %20 = arith.addf %18, %19 : vector<256x128xf32>
    %cst_17 = arith.constant 0.000000e+00 : f32
    %21 = vector.broadcast %cst_17 : f32 to vector<256x128xf32>
    %22 = arith.maximumf %20, %21 : vector<256x128xf32>
    %c0_18 = arith.constant 0 : index
    %c0_19 = arith.constant 0 : index
    %23 = vector.load %arg8[%c0_18, %c0_19] : memref<128x128xf32, #tpu.memory_space<vmem>>, vector<128x128xf32>
    %c0_20 = arith.constant 0 : index
    %c0_21 = arith.constant 0 : index
    %24 = vector.load %arg9[%c0_20, %c0_21] : memref<1x128xf32, #tpu.memory_space<vmem>>, vector<1x128xf32>
    %cst_22 = arith.constant dense<0.000000e+00> : vector<256x128xf32>
    %25 = tpu.matmul %22, %23, %cst_22 {dimension_numbers = #tpu.dot_dimension_numbers<[1], [0], [0], [1], [0, 0, 1, 1], [], []>} : vector<256x128xf32>, vector<128x128xf32>, vector<256x128xf32> -> vector<256x128xf32>
    %26 = vector.broadcast %24 : vector<1x128xf32> to vector<256x128xf32>
    %27 = arith.addf %25, %26 : vector<256x128xf32>
    %c0_23 = arith.constant 0 : index
    %c0_24 = arith.constant 0 : index
    %28 = vector.load %arg10[%c0_23, %c0_24] : memref<256x128xf32, #tpu.memory_space<vmem>>, vector<256x128xf32>
    tpu.vector_store %arg10[%c0_23, %c0_24], %27 {strides = array<i32>} : memref<256x128xf32, #tpu.memory_space<vmem>>, vector<256x128xf32>,
    return
  }
  func.func @transform_0(%arg0: i32) -> (i32, i32) {
    %c0_i32 = arith.constant 0 : i32
    %c0_i32_0 = arith.constant 0 : i32
    return %arg0, %c0_i32 : i32, i32
  }
  func.func @transform_1(%arg0: i32) -> (i32, i32) {
    %c0_i32 = arith.constant 0 : i32
    %c0_i32_0 = arith.constant 0 : i32
    %c0_i32_1 = arith.constant 0 : i32
    return %c0_i32, %c0_i32_0 : i32, i32
  }
  func.func @transform_2(%arg0: i32) -> (i32, i32) {
    %c0_i32 = arith.constant 0 : i32
    %c0_i32_0 = arith.constant 0 : i32
    %c0_i32_1 = arith.constant 0 : i32
    return %c0_i32, %c0_i32_0 : i32, i32
  }
  func.func @transform_3(%arg0: i32) -> (i32, i32) {
    %c0_i32 = arith.constant 0 : i32
    %c0_i32_0 = arith.constant 0 : i32
    %c0_i32_1 = arith.constant 0 : i32
    return %c0_i32, %c0_i32_0 : i32, i32
  }
  func.func @transform_4(%arg0: i32) -> (i32, i32) {
    %c0_i32 = arith.constant 0 : i32
    %c0_i32_0 = arith.constant 0 : i32
    %c0_i32_1 = arith.constant 0 : i32
    return %c0_i32, %c0_i32_0 : i32, i32
  }
  func.func @transform_5(%arg0: i32) -> (i32, i32) {
    %c0_i32 = arith.constant 0 : i32
    %c0_i32_0 = arith.constant 0 : i32
    %c0_i32_1 = arith.constant 0 : i32
    return %c0_i32, %c0_i32_0 : i32, i32
  }
  func.func @transform_6(%arg0: i32) -> (i32, i32) {
    %c0_i32 = arith.constant 0 : i32
    %c0_i32_0 = arith.constant 0 : i32
    %c0_i32_1 = arith.constant 0 : i32
    return %c0_i32, %c0_i32_0 : i32, i32
  }
  func.func @transform_7(%arg0: i32) -> (i32, i32) {
    %c0_i32 = arith.constant 0 : i32
    %c0_i32_0 = arith.constant 0 : i32
    %c0_i32_1 = arith.constant 0 : i32
    return %c0_i32, %c0_i32_0 : i32, i32
  }
  func.func @transform_8(%arg0: i32) -> (i32, i32) {
    %c0_i32 = arith.constant 0 : i32
    %c0_i32_0 = arith.constant 0 : i32
    %c0_i32_1 = arith.constant 0 : i32
    return %c0_i32, %c0_i32_0 : i32, i32
  }
  func.func @transform_9(%arg0: i32) -> (i32, i32) {
    %c0_i32 = arith.constant 0 : i32
    %c0_i32_0 = arith.constant 0 : i32
    return %arg0, %c0_i32 : i32, i32
  }
}

module attributes {stable_mosaic.version = 11 : i64} {
  func.func @_mlp_kernel(%arg0: i32, %arg1: memref<256x128xf32, #tpu.memory_space<vmem>>, %arg2: memref<128x128xf32, #tpu.memory_space<vmem>>, %arg3: memref<1x128xf32, #tpu.memory_space<vmem>>, %arg4: memref<128x128xf32, #tpu.memory_space<vmem>>, %arg5: memref<1x128xf32, #tpu.memory_space<vmem>>, %arg6: memref<128x128xf32, #tpu.memory_space<vmem>>, %arg7: memref<1x128xf32, #tpu.memory_space<vmem>>, %arg8: memref<128x128xf32, #tpu.memory_space<vmem>>, %arg9: memref<1x128xf32, #tpu.memory_space<vmem>>, %arg10: memref<256x128xf32, #tpu.memory_space<vmem>>) attributes {dimension_semantics = [#tpu.dimension_semantics<parallel>], iteration_bounds = array<i64: 4>, scalar_prefetch = 0 : i64, scratch_operands = 0 : i64, tpu.core_type = #tpu.core_type<tc>, window_params = [{transform_indices = @transform_0, window_bounds = array<i64: 256, 128>}, {pipeline_mode = #tpu.pipeline_mode<synchronous>, transform_indices = @transform_1, window_bounds = array<i64: 128, 128>}, {pipeline_mode = #tpu.pipeline_mode<synchronous>, transform_indices = @transform_2, window_bounds = array<i64: 1, 128>}, {pipeline_mode = #tpu.pipeline_mode<synchronous>, transform_indices = @transform_3, window_bounds = array<i64: 128, 128>}, {pipeline_mode = #tpu.pipeline_mode<synchronous>, transform_indices = @transform_4, window_bounds = array<i64: 1, 128>}, {pipeline_mode = #tpu.pipeline_mode<synchronous>, transform_indices = @transform_5, window_bounds = array<i64: 128, 128>}, {pipeline_mode = #tpu.pipeline_mode<synchronous>, transform_indices = @transform_6, window_bounds = array<i64: 1, 128>}, {pipeline_mode = #tpu.pipeline_mode<synchronous>, transform_indices = @transform_7, window_bounds = array<i64: 128, 128>}, {pipeline_mode = #tpu.pipeline_mode<synchronous>, transform_indices = @transform_8, window_bounds = array<i64: 1, 128>}, {transform_indices = @transform_9, window_bounds = array<i64: 256, 128>}]} {
    %c0 = arith.constant 0 : index
    %c0_0 = arith.constant 0 : index
    %0 = vector.load %arg1[%c0, %c0_0] : memref<256x128xf32, #tpu.memory_space<vmem>>, vector<256x128xf32>
    %c0_1 = arith.constant 0 : index
    %c0_2 = arith.constant 0 : index
    %1 = vector.load %arg2[%c0_1, %c0_2] : memref<128x128xf32, #tpu.memory_space<vmem>>, vector<128x128xf32>
    %c0_3 = arith.constant 0 : index
    %c0_4 = arith.constant 0 : index
    %2 = vector.load %arg3[%c0_3, %c0_4] : memref<1x128xf32, #tpu.memory_space<vmem>>, vector<1x128xf32>
    %cst = arith.constant dense<0.000000e+00> : vector<256x128xf32>
    %3 = tpu.matmul %0, %1, %cst {dimension_numbers = #tpu.dot_dimension_numbers<[1], [0], [0], [1], [0, 0, 1, 1], [], []>} : vector<256x128xf32>, vector<128x128xf32>, vector<256x128xf32> -> vector<256x128xf32>
    %4 = vector.broadcast %2 : vector<1x128xf32> to vector<256x128xf32>
    %5 = arith.addf %3, %4 : vector<256x128xf32>
    %cst_5 = arith.constant 0.000000e+00 : f32
    %6 = vector.broadcast %cst_5 : f32 to vector<256x128xf32>
    %7 = arith.maximumf %5, %6 : vector<256x128xf32>
    %c0_6 = arith.constant 0 : index
    %c0_7 = arith.constant 0 : index
    %8 = vector.load %arg4[%c0_6, %c0_7] : memref<128x128xf32, #tpu.memory_space<vmem>>, vector<128x128xf32>
    %c0_8 = arith.constant 0 : index
    %c0_9 = arith.constant 0 : index
    %9 = vector.load %arg5[%c0_8, %c0_9] : memref<1x128xf32, #tpu.memory_space<vmem>>, vector<1x128xf32>
    %cst_10 = arith.constant dense<0.000000e+00> : vector<256x128xf32>
    %10 = tpu.matmul %7, %8, %cst_10 {dimension_numbers = #tpu.dot_dimension_numbers<[1], [0], [0], [1], [0, 0, 1, 1], [], []>} : vector<256x128xf32>, vector<128x128xf32>, vector<256x128xf32> -> vector<256x128xf32>
    %11 = vector.broadcast %9 : vector<1x128xf32> to vector<256x128xf32>
    %12 = arith.addf %10, %11 : vector<256x128xf32>
    %13 = arith.addf %12, %0 : vector<256x128xf32>
    %cst_11 = arith.constant 0.000000e+00 : f32
    %14 = vector.broadcast %cst_11 : f32 to vector<256x128xf32>
    %15 = arith.maximumf %13, %14 : vector<256x128xf32>
    %c0_12 = arith.constant 0 : index
    %c0_13 = arith.constant 0 : index
    %16 = vector.load %arg6[%c0_12, %c0_13] : memref<128x128xf32, #tpu.memory_space<vmem>>, vector<128x128xf32>
    %c0_14 = arith.constant 0 : index
    %c0_15 = arith.constant 0 : index
    %17 = vector.load %arg7[%c0_14, %c0_15] : memref<1x128xf32, #tpu.memory_space<vmem>>, vector<1x128xf32>
    %cst_16 = arith.constant dense<0.000000e+00> : vector<256x128xf32>
    %18 = tpu.matmul %15, %16, %cst_16 {dimension_numbers = #tpu.dot_dimension_numbers<[1], [0], [0], [1], [0, 0, 1, 1], [], []>} : vector<256x128xf32>, vector<128x128xf32>, vector<256x128xf32> -> vector<256x128xf32>
    %19 = vector.broadcast %17 : vector<1x128xf32> to vector<256x128xf32>
    %20 = arith.addf %18, %19 : vector<256x128xf32>
    %cst_17 = arith.constant 0.000000e+00 : f32
    %21 = vector.broadcast %cst_17 : f32 to vector<256x128xf32>
    %22 = arith.maximumf %20, %21 : vector<256x128xf32>
    %c0_18 = arith.constant 0 : index
    %c0_19 = arith.constant 0 : index
    %23 = vector.load %arg8[%c0_18, %c0_19] : memref<128x128xf32, #tpu.memory_space<vmem>>, vector<128x128xf32>
    %c0_20 = arith.constant 0 : index
    %c0_21 = arith.constant 0 : index
    %24 = vector.load %arg9[%c0_20, %c0_21] : memref<1x128xf32, #tpu.memory_space<vmem>>, vector<1x128xf32>
    %cst_22 = arith.constant dense<0.000000e+00> : vector<256x128xf32>
    %25 = tpu.matmul %22, %23, %cst_22 {dimension_numbers = #tpu.dot_dimension_numbers<[1], [0], [0], [1], [0, 0, 1, 1], [], []>} : vector<256x128xf32>, vector<128x128xf32>, vector<256x128xf32> -> vector<256x128xf32>
    %26 = vector.broadcast %24 : vector<1x128xf32> to vector<256x128xf32>
    %27 = arith.addf %25, %26 : vector<256x128xf32>
    %c0_23 = arith.constant 0 : index
    %c0_24 = arith.constant 0 : index
    %28 = vector.load %arg10[%c0_23, %c0_24] : memref<256x128xf32, #tpu.memory_space<vmem>>, vector<256x128xf32>
    tpu.vector_store %arg10[%c0_23, %c0_24], %27 {strides = array<i32>} : memref<256x128xf32, #tpu.memory_space<vmem>>, vector<256x128xf32>,
    return
  }
  func.func @transform_0(%arg0: i32) -> (i32, i32) {
    %c0_i32 = arith.constant 0 : i32
    %c0_i32_0 = arith.constant 0 : i32
    return %arg0, %c0_i32 : i32, i32
  }
  func.func @transform_1(%arg0: i32) -> (i32, i32) {
    %c0_i32 = arith.constant 0 : i32
    %c0_i32_0 = arith.constant 0 : i32
    %c0_i32_1 = arith.constant 0 : i32
    return %c0_i32, %c0_i32_0 : i32, i32
  }
  func.func @transform_2(%arg0: i32) -> (i32, i32) {
    %c0_i32 = arith.constant 0 : i32
    %c0_i32_0 = arith.constant 0 : i32
    %c0_i32_1 = arith.constant 0 : i32
    return %c0_i32, %c0_i32_0 : i32, i32
  }
  func.func @transform_3(%arg0: i32) -> (i32, i32) {
    %c0_i32 = arith.constant 0 : i32
    %c0_i32_0 = arith.constant 0 : i32
    %c0_i32_1 = arith.constant 0 : i32
    return %c0_i32, %c0_i32_0 : i32, i32
  }
  func.func @transform_4(%arg0: i32) -> (i32, i32) {
    %c0_i32 = arith.constant 0 : i32
    %c0_i32_0 = arith.constant 0 : i32
    %c0_i32_1 = arith.constant 0 : i32
    return %c0_i32, %c0_i32_0 : i32, i32
  }
  func.func @transform_5(%arg0: i32) -> (i32, i32) {
    %c0_i32 = arith.constant 0 : i32
    %c0_i32_0 = arith.constant 0 : i32
    %c0_i32_1 = arith.constant 0 : i32
    return %c0_i32, %c0_i32_0 : i32, i32
  }
  func.func @transform_6(%arg0: i32) -> (i32, i32) {
    %c0_i32 = arith.constant 0 : i32
    %c0_i32_0 = arith.constant 0 : i32
    %c0_i32_1 = arith.constant 0 : i32
    return %c0_i32, %c0_i32_0 : i32, i32
  }
  func.func @transform_7(%arg0: i32) -> (i32, i32) {
    %c0_i32 = arith.constant 0 : i32
    %c0_i32_0 = arith.constant 0 : i32
    %c0_i32_1 = arith.constant 0 : i32
    return %c0_i32, %c0_i32_0 : i32, i32
  }
  func.func @transform_8(%arg0: i32) -> (i32, i32) {
    %c0_i32 = arith.constant 0 : i32
    %c0_i32_0 = arith.constant 0 : i32
    %c0_i32_1 = arith.constant 0 : i32
    return %c0_i32, %c0_i32_0 : i32, i32
  }
  func.func @transform_9(%arg0: i32) -> (i32, i32) {
    %c0_i32 = arith.constant 0 : i32
    %c0_i32_0 = arith.constant 0 : i32
    return %arg0, %c0_i32 : i32, i32
  }
}

</mosaic_0001>

<bundles_post_ra>
// kernel: fwd.1
= control target key start
LH: loop header
LB: loop body
LE: loop exit
PB: predicated region body
PF: predicated region fallthrough
CT: control target
= control target key end

     0   :  { %s1197_s30 = smov 0   ;;  %s1757_s0 = inlined_call_operand.vmem [shape: f32[1024,128], index: 0, kind: input, shape index: {}]   ;;  %s1758_s1 = inlined_call_operand.vmem [shape: f32[128,128], index: 1, kind: input, shape index: {}]   ;;  %s1759_s2 = inlined_call_operand.vmem [shape: f32[1,128], index: 2, kind: input, shape index: {}]   ;;  %s1760_s3 = inlined_call_operand.vmem [shape: f32[128,128], index: 3, kind: input, shape index: {}]   ;;  %s1761_s4 = inlined_call_operand.vmem [shape: f32[1,128], index: 4, kind: input, shape index: {}]   ;;  %s1762_s5 = inlined_call_operand.vmem [shape: f32[128,128], index: 5, kind: input, shape index: {}]   ;;  %s1763_s6 = inlined_call_operand.vmem [shape: f32[1,128], index: 6, kind: input, shape index: {}]   ;;  %s1764_s7 = inlined_call_operand.vmem [shape: f32[128,128], index: 7, kind: input, shape index: {}]   ;;  %s1765_s8 = inlined_call_operand.vmem [shape: f32[1,128], index: 8, kind: input, shape index: {}]   ;;  %s1766_s9 = inlined_call_operand.vmem [shape: f32[1024,128], index: 9, kind: output, shape index: {}]  }
   0x1 LB: > { %s1116_s10 = sadd.s32 4294967295, %s1145_s30   ;;  %p1120_p0 = scmp.ge.s32.totalorder %s1145_s30, 1  ;;  %s1145_s30 = sphi %s1197_s30, %s19_s30  }
   0x2   : > { %p288_p1 = scmp.lt.s32.totalorder %s1145_s30, 5 }
   0x4   : > { %p289_p2 = pnand %p1120_p0, %p288_p1 }
   0x5   : > { %s1121_s27 = sshll.u32 (!%p289_p2), %s1116_s10, 5 }
   0x6   : > { %292 = sbr.rel (%p289_p2) target bundleno = 824 (0x338), region = 56  ;;  %p325_p3 = scmp.lt.s32.totalorder (!%p289_p2), %s1121_s27, 127 }
   0xb   : > { %v383_v0 = vld [vmem:[%s1758_s1 + $0x78] sm:$0xff]  ;;  %v382_v1 = vld [vmem:[%s1758_s1 + $0x70] sm:$0xff]  ;;  %v381_v2 = vld [vmem:[%s1758_s1 + $0x68] sm:$0xff]  ;;  %s1768_s27 = smov (!%p325_p3, %s1121_s27), 127 }
   0xc   : > { %388 = vmatpush.msra.mxu0 %v383_v0  ;;  %v380_v3 = vld [vmem:[%s1758_s1 + $0x60] sm:$0xff]  ;;  %v379_v4 = vld [vmem:[%s1758_s1 + $0x58] sm:$0xff]  ;;  %v378_v5 = vld [vmem:[%s1758_s1 + $0x50] sm:$0xff]  ;;  %s1122_s18 = sshll.u32 %s1768_s27, 3 }
   0xd   : > { %v377_v6 = vld [vmem:[%s1758_s1 + $0x48] sm:$0xff]  ;;  %v376_v7 = vld [vmem:[%s1758_s1 + $0x40] sm:$0xff]  ;;  %v375_v8 = vld [vmem:[%s1758_s1 + $0x38] sm:$0xff]  ;;  %s1258_s25 = scalar_lea.vmem %s1757_s0, %s1122_s18  ;;  %s1673_s11 = scalar_lea.vmem %s1766_s9, %s1122_s18 }
   0xe   : > { %389 = vmatpush.msra.mxu0 %v382_v1  ;;  %v374_v9 = vld [vmem:[%s1758_s1 + $0x30] sm:$0xff]  ;;  %v373_v10 = vld [vmem:[%s1758_s1 + $0x28] sm:$0xff]  ;;  %v372_v11 = vld [vmem:[%s1758_s1 + $0x20] sm:$0xff] }
   0xf   : > { %v371_v12 = vld [vmem:[%s1758_s1 + $0x18] sm:$0xff]  ;;  %v370_v13 = vld [vmem:[%s1758_s1 + $0x10] sm:$0xff]  ;;  %v369_v14 = vld [vmem:[%s1758_s1 + $0x8] sm:$0xff] }
  0x10   : > { %390 = vmatpush.msra.mxu0 %v381_v2  ;;  %v368_v15 = vld [vmem:[%s1758_s1] sm:$0xff]  ;;  %v1268_v17 = vld [vmem:[%s1258_s25 + $0x8] sm:$0xff]  ;;  %v1272_v18 = vld [vmem:[%s1258_s25 + $0x10] sm:$0xff] }
  0x11   : > { %v1264_v16 = vld [vmem:[%s1258_s25] sm:$0xff]  ;;  %v1276_v19 = vld [vmem:[%s1258_s25 + $0x18] sm:$0xff]  ;;  %v1284_v21 = vld [vmem:[%s1258_s25 + $0x28] sm:$0xff] }
  0x12   : > { %391 = vmatpush.msra.mxu0 %v380_v3  ;;  %v1280_v20 = vld [vmem:[%s1258_s25 + $0x20] sm:$0xff]  ;;  %v1288_v22 = vld [vmem:[%s1258_s25 + $0x30] sm:$0xff]  ;;  %v1292_v23 = vld [vmem:[%s1258_s25 + $0x38] sm:$0xff] }
  0x13   : > { %v1296_v24 = vld [vmem:[%s1258_s25 + $0x40] sm:$0xff]  ;;  %v548_v25 = vld [vmem:[%s1760_s3 + $0x78] sm:$0xff]  ;;  %v547_v26 = vld [vmem:[%s1760_s3 + $0x70] sm:$0xff] }
  0x14   : > { %392 = vmatpush.msra.mxu0 %v379_v4  ;;  %553 = vmatpush.msra.mxu1 %v548_v25  ;;  %v546_v27 = vld [vmem:[%s1760_s3 + $0x68] sm:$0xff]  ;;  %v545_v29 = vld [vmem:[%s1760_s3 + $0x60] sm:$0xff]  ;;  %v544_v30 = vld [vmem:[%s1760_s3 + $0x58] sm:$0xff] }
  0x15   : > { %v1309_v28 = vld [vmem:[%s1258_s25 + $0x48] sm:$0xff]  ;;  %v543_v31 = vld [vmem:[%s1760_s3 + $0x50] sm:$0xff]  ;;  %v541_v34 = vld [vmem:[%s1760_s3 + $0x40] sm:$0xff] }
  0x16   : > { %393 = vmatpush.msra.mxu0 %v378_v5  ;;  %554 = vmatpush.msra.mxu1 %v547_v26  ;;  %v542_v32 = vld [vmem:[%s1760_s3 + $0x48] sm:$0xff]  ;;  %v1325_v33 = vld [vmem:[%s1258_s25 + $0x50] sm:$0xff]  ;;  %v540_v35 = vld [vmem:[%s1760_s3 + $0x38] sm:$0xff] }
  0x17   : > { %v539_v36 = vld [vmem:[%s1760_s3 + $0x30] sm:$0xff]  ;;  %v538_v37 = vld [vmem:[%s1760_s3 + $0x28] sm:$0xff]  ;;  %v1341_v38 = vld [vmem:[%s1258_s25 + $0x58] sm:$0xff] }
  0x18   : > { %394 = vmatpush.msra.mxu0 %v377_v6  ;;  %555 = vmatpush.msra.mxu1 %v546_v27  ;;  %v537_v39 = vld [vmem:[%s1760_s3 + $0x20] sm:$0xff]  ;;  %v536_v40 = vld [vmem:[%s1760_s3 + $0x18] sm:$0xff]  ;;  %v535_v41 = vld [vmem:[%s1760_s3 + $0x10] sm:$0xff] }
  0x19   : > { %v1354_v42 = vld [vmem:[%s1258_s25 + $0x60] sm:$0xff]  ;;  %v534_v43 = vld [vmem:[%s1760_s3 + $0x8] sm:$0xff]  ;;  %v1368_v46 = vld [vmem:[%s1258_s25 + $0x70] sm:$0xff] }
  0x1a   : > { %395 = vmatpush.msra.mxu0 %v376_v7  ;;  %556 = vmatpush.msra.mxu1 %v545_v29  ;;  %v533_v44 = vld [vmem:[%s1760_s3] sm:$0xff]  ;;  %v1364_v45 = vld [vmem:[%s1258_s25 + $0x68] sm:$0xff]  ;;  %v1372_v47 = vld [vmem:[%s1258_s25 + $0x78] sm:$0xff] }
  0x1b   : > { %v1378_v48 = vld [vmem:[%s1759_s2] ss:$0 sm:$0xff]  ;;  %v1386_v54 = vld [vmem:[%s1258_s25 + $0x88] sm:$0xff]  ;;  %v1391_v58 = vld [vmem:[%s1258_s25 + $0x90] sm:$0xff] }
  0x1c   : > { %396 = vmatpush.msra.mxu0 %v375_v8  ;;  %557 = vmatpush.msra.mxu1 %v544_v30  ;;  %v1381_v50 = vld [vmem:[%s1258_s25 + $0x80] sm:$0xff]  ;;  %v1396_v62 = vld [vmem:[%s1258_s25 + $0x98] sm:$0xff]  ;;  %v1406_v6 = vld [vmem:[%s1258_s25 + $0xa8] sm:$0xff] }
  0x1d   : > { %v1401_v2 = vld [vmem:[%s1258_s25 + $0xa0] sm:$0xff] }
  0x1e   : > { %397 = vmatpush.msra.mxu0 %v374_v9  ;;  %558 = vmatpush.msra.mxu1 %v543_v31  ;;  %v1421_v27 = vld [vmem:[%s1258_s25 + $0xc0] sm:$0xff] }
  0x20   : > { %398 = vmatpush.msra.mxu0 %v373_v10  ;;  %559 = vmatpush.msra.mxu1 %v542_v32  ;;  %v1411_v10 = vld [vmem:[%s1258_s25 + $0xb0] sm:$0xff]  ;;  %v1426_v32 = vld [vmem:[%s1258_s25 + $0xc8] sm:$0xff] }
  0x22   : > { %399 = vmatpush.msra.mxu0 %v372_v11  ;;  %560 = vmatpush.msra.mxu1 %v541_v34 }
  0x24   : > { %400 = vmatpush.msra.mxu0 %v371_v12  ;;  %561 = vmatpush.msra.mxu1 %v540_v35  ;;  %v745_v35 = vld [vmem:[%s1762_s5 + $0x78] sm:$0xff] }
  0x25   : > { %750 = vmatpush.msra.mxu2 %v745_v35 }
  0x26   : > { %401 = vmatpush.msra.mxu0 %v370_v13  ;;  %562 = vmatpush.msra.mxu1 %v539_v36 }
  0x28   : > { %402 = vmatpush.msra.mxu0 %v369_v14  ;;  %563 = vmatpush.msra.mxu1 %v538_v37  ;;  %v1416_v14 = vld [vmem:[%s1258_s25 + $0xb8] sm:$0xff]  ;;  %v744_v37 = vld [vmem:[%s1762_s5 + $0x70] sm:$0xff] }
  0x29   : > { %751 = vmatpush.msra.mxu2 %v744_v37 }
  0x2a   : > { %403 = vmatpush.msra.mxu0 %v368_v15  ;;  %564 = vmatpush.msra.mxu1 %v537_v39  ;;  %v743_v39 = vld [vmem:[%s1762_s5 + $0x68] sm:$0xff] }
  0x2b   : > { %404 = vmatmul.f32.vlgmr.msra.gmra.mxu0 %v1264_v16  ;;  %752 = vmatpush.msra.mxu2 %v743_v39 }
  0x2c   : > { %565 = vmatpush.msra.mxu1 %v536_v40  ;;  %v742_v40 = vld [vmem:[%s1762_s5 + $0x60] sm:$0xff] }
  0x2d   : > { %753 = vmatpush.msra.mxu2 %v742_v40  ;;  %v1511_v40 = vld [vmem:[%s1761_s4] ss:$0 sm:$0xff] }
  0x2e   : > { %566 = vmatpush.msra.mxu1 %v535_v41 }
  0x30   : > { %567 = vmatpush.msra.mxu1 %v534_v43  ;;  %v1443_v43 = vld [vmem:[%s1258_s25 + $0xd0] sm:$0xff] }
  0x32   : > { %568 = vmatpush.msra.mxu1 %v533_v44 }
  0x33   : > { %407 = vmatmul.f32.gmra.mxu0 %v1268_v17 }
  0x3b   : > { %410 = vmatmul.f32.gmra.mxu0 %v1272_v18 }
  0x43   : > { %413 = vmatmul.f32.gmra.mxu0 %v1276_v19 }
  0x4b   : > { %416 = vmatmul.f32.gmra.mxu0 %v1280_v20 }
  0x53   : > { %419 = vmatmul.f32.gmra.mxu0 %v1284_v21 }
  0x5b   : > { %422 = vmatmul.f32.gmra.mxu0 %v1288_v22 }
  0x63   : > { %425 = vmatmul.f32.gmra.mxu0 %v1292_v23 }
  0x6b   : > { %428 = vmatmul.f32.gmra.mxu0 %v1296_v24 }
  0x73   : > { %431 = vmatmul.f32.gmra.mxu0 %v1309_v28 }
  0x7b   : > { %434 = vmatmul.f32.gmra.mxu0 %v1325_v33 }
  0x83   : > { %437 = vmatmul.f32.gmra.mxu0 %v1341_v38 }
  0x8b   : > { %440 = vmatmul.f32.gmra.mxu0 %v1354_v42 }
  0x93   : > { %443 = vmatmul.f32.gmra.mxu0 %v1364_v45 }
  0x9b   : > { %446 = vmatmul.f32.gmra.mxu0 %v1368_v46 }
  0xa3   : > { %449 = vmatmul.f32.gmra.mxu0 %v1372_v47 }
  0xa8   : > { %v405_v49 = vpop.f32.mrf.mxu0 }
  0xa9   : > { %v406_v51 = vadd.f32 %v1378_v48, %v405_v49  ;;  %v741_v49 = vld [vmem:[%s1762_s5 + $0x58] sm:$0xff] }
  0xaa   : > { %754 = vmatpush.msra.mxu2 %v741_v49 }
  0xab   : > { %452 = vmatmul.f32.gmra.mxu0 %v1381_v50  ;;  %v501_v52 = vmax.f32 %v406_v51, 0.0 }
  0xad   : > { %569 = vmatmul.f32.vlgmr.msra.gmra.mxu1 %v501_v52  ;;  %v740_v52 = vld [vmem:[%s1762_s5 + $0x50] sm:$0xff] }
  0xae   : > { %755 = vmatpush.msra.mxu2 %v740_v52 }
  0xb0   : > { %v408_v53 = vpop.f32.mrf.mxu0 }
  0xb1   : > { %v409_v55 = vadd.f32 %v1378_v48, %v408_v53  ;;  %v739_v53 = vld [vmem:[%s1762_s5 + $0x48] sm:$0xff] }
  0xb2   : > { %756 = vmatpush.msra.mxu2 %v739_v53 }
  0xb3   : > { %455 = vmatmul.f32.gmra.mxu0 %v1386_v54  ;;  %v502_v56 = vmax.f32 %v409_v55, 0.0  ;;  %v738_v55 = vld [vmem:[%s1762_s5 + $0x40] sm:$0xff] }
  0xb4   : > { %757 = vmatpush.msra.mxu2 %v738_v55 }
  0xb5   : > { %572 = vmatmul.f32.gmra.mxu1 %v502_v56 }
  0xb8   : > { %v411_v57 = vpop.f32.mrf.mxu0 }
  0xb9   : > { %v412_v59 = vadd.f32 %v1378_v48, %v411_v57  ;;  %v1460_v57 = vld [vmem:[%s1258_s25 + $0xd8] sm:$0xff] }
  0xbb   : > { %458 = vmatmul.f32.gmra.mxu0 %v1391_v58  ;;  %v503_v60 = vmax.f32 %v412_v59, 0.0 }
  0xbd   : > { %575 = vmatmul.f32.gmra.mxu1 %v503_v60  ;;  %v737_v60 = vld [vmem:[%s1762_s5 + $0x38] sm:$0xff] }
  0xbe   : > { %758 = vmatpush.msra.mxu2 %v737_v60 }
  0xc0   : > { %v414_v61 = vpop.f32.mrf.mxu0 }
  0xc1   : > { %v415_v63 = vadd.f32 %v1378_v48, %v414_v61 }
  0xc3   : > { %461 = vmatmul.f32.gmra.mxu0 %v1396_v62  ;;  %v504_v0 = vmax.f32 %v415_v63, 0.0  ;;  %v736_v63 = vld [vmem:[%s1762_s5 + $0x30] sm:$0xff] }
  0xc4   : > { %759 = vmatpush.msra.mxu2 %v736_v63 }
  0xc5   : > { %578 = vmatmul.f32.gmra.mxu1 %v504_v0  ;;  %v735_v0 = vld [vmem:[%s1762_s5 + $0x28] sm:$0xff] }
  0xc6   : > { %760 = vmatpush.msra.mxu2 %v735_v0 }
  0xc8   : > { %v417_v1 = vpop.f32.mrf.mxu0 }
  0xc9   : > { %v418_v3 = vadd.f32 %v1378_v48, %v417_v1  ;;  %v734_v1 = vld [vmem:[%s1762_s5 + $0x20] sm:$0xff] }
  0xca   : > { %761 = vmatpush.msra.mxu2 %v734_v1 }
  0xcb   : > { %464 = vmatmul.f32.gmra.mxu0 %v1401_v2  ;;  %v505_v4 = vmax.f32 %v418_v3, 0.0 }
  0xcd   : > { %581 = vmatmul.f32.gmra.mxu1 %v505_v4  ;;  %v1477_v4 = vld [vmem:[%s1258_s25 + $0xe0] sm:$0xff] }
  0xd0   : > { %v420_v5 = vpop.f32.mrf.mxu0 }
  0xd1   : > { %v421_v7 = vadd.f32 %v1378_v48, %v420_v5 }
  0xd3   : > { %467 = vmatmul.f32.gmra.mxu0 %v1406_v6  ;;  %v506_v8 = vmax.f32 %v421_v7, 0.0  ;;  %v733_v7 = vld [vmem:[%s1762_s5 + $0x18] sm:$0xff] }
  0xd4   : > { %762 = vmatpush.msra.mxu2 %v733_v7 }
  0xd5   : > { %584 = vmatmul.f32.gmra.mxu1 %v506_v8 }
  0xd8   : > { %v423_v9 = vpop.f32.mrf.mxu0 }
  0xd9   : > { %v424_v11 = vadd.f32 %v1378_v48, %v423_v9  ;;  %v732_v9 = vld [vmem:[%s1762_s5 + $0x10] sm:$0xff] }
  0xda   : > { %763 = vmatpush.msra.mxu2 %v732_v9 }
  0xdb   : > { %470 = vmatmul.f32.gmra.mxu0 %v1411_v10  ;;  %v507_v12 = vmax.f32 %v424_v11, 0.0  ;;  %v731_v11 = vld [vmem:[%s1762_s5 + $0x8] sm:$0xff] }
  0xdc   : > { %764 = vmatpush.msra.mxu2 %v731_v11 }
  0xdd   : > { %587 = vmatmul.f32.gmra.mxu1 %v507_v12  ;;  %v730_v12 = vld [vmem:[%s1762_s5] sm:$0xff] }
  0xde   : > { %765 = vmatpush.msra.mxu2 %v730_v12 }
  0xe0   : > { %v426_v13 = vpop.f32.mrf.mxu0 }
  0xe1   : > { %v427_v15 = vadd.f32 %v1378_v48, %v426_v13 }
  0xe3   : > { %473 = vmatmul.f32.gmra.mxu0 %v1416_v14  ;;  %v508_v25 = vmax.f32 %v427_v15, 0.0  ;;  %v1494_v15 = vld [vmem:[%s1258_s25 + $0xe8] sm:$0xff] }
  0xe5   : > { %590 = vmatmul.f32.gmra.mxu1 %v508_v25 }
  0xe8   : > { %v429_v26 = vpop.f32.mrf.mxu0 }
  0xe9   : > { %v430_v29 = vadd.f32 %v1378_v48, %v429_v26 }
  0xeb   : > { %v509_v30 = vmax.f32 %v430_v29, 0.0  ;;  %476 = vmatmul.f32.gmra.mxu0 %v1421_v27 }
  0xed   : > { %593 = vmatmul.f32.gmra.mxu1 %v509_v30  ;;  %v1499_v30 = vld [vmem:[%s1258_s25 + $0xf0] sm:$0xff] }
  0xf0   : > { %v432_v31 = vpop.f32.mrf.mxu0 }
  0xf1   : > { %v433_v34 = vadd.f32 %v1378_v48, %v432_v31 }
  0xf3   : > { %v510_v36 = vmax.f32 %v433_v34, 0.0  ;;  %479 = vmatmul.f32.gmra.mxu0 %v1426_v32 }
  0xf5   : > { %596 = vmatmul.f32.gmra.mxu1 %v510_v36  ;;  %v1504_v36 = vld [vmem:[%s1258_s25 + $0xf8] sm:$0xff] }
  0xf8   : > { %v435_v41 = vpop.f32.mrf.mxu0 }
  0xf9   : > { %v436_v44 = vadd.f32 %v1378_v48, %v435_v41 }
  0xfb   : > { %v511_v51 = vmax.f32 %v436_v44, 0.0  ;;  %482 = vmatmul.f32.gmra.mxu0 %v1443_v43 }
  0xfd   : > { %599 = vmatmul.f32.gmra.mxu1 %v511_v51 }
 0x100   : > { %v438_v56 = vpop.f32.mrf.mxu0 }
 0x101   : > { %v439_v59 = vadd.f32 %v1378_v48, %v438_v56 }
 0x103   : > { %v512_v61 = vmax.f32 %v439_v59, 0.0  ;;  %485 = vmatmul.f32.gmra.mxu0 %v1460_v57 }
 0x105   : > { %602 = vmatmul.f32.gmra.mxu1 %v512_v61 }
 0x108   : > { %v441_v3 = vpop.f32.mrf.mxu0 }
 0x109   : > { %v442_v5 = vadd.f32 %v1378_v48, %v441_v3 }
 0x10b   : > { %v513_v8 = vmax.f32 %v442_v5, 0.0  ;;  %488 = vmatmul.f32.gmra.mxu0 %v1477_v4 }
 0x10d   : > { %605 = vmatmul.f32.gmra.mxu1 %v513_v8 }
 0x110   : > { %v444_v13 = vpop.f32.mrf.mxu0 }
 0x111   : > { %v445_v25 = vadd.f32 %v1378_v48, %v444_v13 }
 0x113   : > { %v514_v26 = vmax.f32 %v445_v25, 0.0  ;;  %491 = vmatmul.f32.gmra.mxu0 %v1494_v15 }
 0x115   : > { %608 = vmatmul.f32.gmra.mxu1 %v514_v26 }
 0x118   : > { %v447_v29 = vpop.f32.mrf.mxu0 }
 0x119   : > { %v448_v31 = vadd.f32 %v1378_v48, %v447_v29 }
 0x11b   : > { %v515_v34 = vmax.f32 %v448_v31, 0.0  ;;  %494 = vmatmul.f32.gmra.mxu0 %v1499_v30 }
 0x11d   : > { %611 = vmatmul.f32.gmra.mxu1 %v515_v34 }
 0x120   : > { %v450_v35 = vpop.f32.mrf.mxu0 }
 0x121   : > { %v451_v37 = vadd.f32 %v1378_v48, %v450_v35 }
 0x123   : > { %v516_v39 = vmax.f32 %v451_v37, 0.0  ;;  %497 = vmatmul.f32.gmra.mxu0 %v1504_v36 }
 0x125   : > { %614 = vmatmul.f32.gmra.mxu1 %v516_v39 }
 0x128   : > { %v453_v41 = vpop.f32.mrf.mxu0 }
 0x129   : > { %v454_v44 = vadd.f32 %v1378_v48, %v453_v41 }
 0x12a   : > { %v570_v49 = vpop.f32.mrf.mxu1 }
 0x12b   : > { %v517_v51 = vmax.f32 %v454_v44, 0.0  ;;  %v571_v52 = vadd.f32 %v1511_v40, %v570_v49 }
 0x12d   : > { %617 = vmatmul.f32.gmra.mxu1 %v517_v51  ;;  %v666_v53 = vadd.f32 %v571_v52, %v1264_v16 }
 0x12f   : > { %v698_v55 = vmax.f32 %v666_v53, 0.0 }
 0x130   : > { %v456_v56 = vpop.f32.mrf.mxu0 }
 0x131   : > { %v457_v59 = vadd.f32 %v1378_v48, %v456_v56  ;;  %766 = vmatmul.f32.vlgmr.msra.gmra.mxu2 %v698_v55 }
 0x132   : > { %v573_v60 = vpop.f32.mrf.mxu1 }
 0x133   : > { %v518_v61 = vmax.f32 %v457_v59, 0.0  ;;  %v574_v63 = vadd.f32 %v1511_v40, %v573_v60 }
 0x135   : > { %620 = vmatmul.f32.gmra.mxu1 %v518_v61  ;;  %v667_v0 = vadd.f32 %v574_v63, %v1268_v17 }
 0x137   : > { %v699_v1 = vmax.f32 %v667_v0, 0.0 }
 0x138   : > { %v459_v3 = vpop.f32.mrf.mxu0 }
 0x139   : > { %v460_v5 = vadd.f32 %v1378_v48, %v459_v3  ;;  %769 = vmatmul.f32.gmra.mxu2 %v699_v1 }
 0x13a   : > { %v576_v7 = vpop.f32.mrf.mxu1 }
 0x13b   : > { %v519_v8 = vmax.f32 %v460_v5, 0.0  ;;  %v577_v16 = vadd.f32 %v1511_v40, %v576_v7 }
 0x13d   : > { %623 = vmatmul.f32.gmra.mxu1 %v519_v8  ;;  %v668_v9 = vadd.f32 %v577_v16, %v1272_v18 }
 0x13f   : > { %v700_v11 = vmax.f32 %v668_v9, 0.0 }
 0x140   : > { %v462_v12 = vpop.f32.mrf.mxu0 }
 0x141   : > { %v463_v13 = vadd.f32 %v1378_v48, %v462_v12  ;;  %772 = vmatmul.f32.gmra.mxu2 %v700_v11 }
 0x142   : > { %v579_v25 = vpop.f32.mrf.mxu1 }
 0x143   : > { %v520_v26 = vmax.f32 %v463_v13, 0.0  ;;  %v580_v17 = vadd.f32 %v1511_v40, %v579_v25 }
 0x145   : > { %626 = vmatmul.f32.gmra.mxu1 %v520_v26  ;;  %v669_v29 = vadd.f32 %v580_v17, %v1276_v19 }
 0x147   : > { %v701_v31 = vmax.f32 %v669_v29, 0.0 }
 0x148   : > { %v465_v34 = vpop.f32.mrf.mxu0 }
 0x149   : > { %v466_v35 = vadd.f32 %v1378_v48, %v465_v34  ;;  %775 = vmatmul.f32.gmra.mxu2 %v701_v31 }
 0x14a   : > { %v582_v37 = vpop.f32.mrf.mxu1 }
 0x14b   : > { %v521_v39 = vmax.f32 %v466_v35, 0.0  ;;  %v583_v18 = vadd.f32 %v1511_v40, %v582_v37 }
 0x14d   : > { %629 = vmatmul.f32.gmra.mxu1 %v521_v39  ;;  %v670_v41 = vadd.f32 %v583_v18, %v1280_v20 }
 0x14f   : > { %v702_v44 = vmax.f32 %v670_v41, 0.0 }
 0x150   : > { %v468_v49 = vpop.f32.mrf.mxu0 }
 0x151   : > { %v469_v51 = vadd.f32 %v1378_v48, %v468_v49  ;;  %778 = vmatmul.f32.gmra.mxu2 %v702_v44 }
 0x152   : > { %v585_v52 = vpop.f32.mrf.mxu1 }
 0x153   : > { %v522_v53 = vmax.f32 %v469_v51, 0.0  ;;  %v586_v19 = vadd.f32 %v1511_v40, %v585_v52  ;;  %v909_v52 = vld [vmem:[%s1764_s7 + $0x70] sm:$0xff] }
 0x155   : > { %632 = vmatmul.f32.gmra.mxu1 %v522_v53  ;;  %v671_v55 = vadd.f32 %v586_v19, %v1284_v21  ;;  %v908_v53 = vld [vmem:[%s1764_s7 + $0x68] sm:$0xff] }
 0x157   : > { %v703_v56 = vmax.f32 %v671_v55, 0.0  ;;  %v907_v55 = vld [vmem:[%s1764_s7 + $0x60] sm:$0xff] }
 0x158   : > { %v471_v59 = vpop.f32.mrf.mxu0 }
 0x159   : > { %v472_v60 = vadd.f32 %v1378_v48, %v471_v59  ;;  %781 = vmatmul.f32.gmra.mxu2 %v703_v56 }
 0x15a   : > { %v588_v61 = vpop.f32.mrf.mxu1 }
 0x15b   : > { %v523_v63 = vmax.f32 %v472_v60, 0.0  ;;  %v589_v20 = vadd.f32 %v1511_v40, %v588_v61  ;;  %v906_v60 = vld [vmem:[%s1764_s7 + $0x58] sm:$0xff] }
 0x15d   : > { %635 = vmatmul.f32.gmra.mxu1 %v523_v63  ;;  %v672_v0 = vadd.f32 %v589_v20, %v1288_v22  ;;  %v905_v20 = vld [vmem:[%s1764_s7 + $0x50] sm:$0xff] }
 0x15f   : > { %v704_v1 = vmax.f32 %v672_v0, 0.0 }
 0x160   : > { %v474_v3 = vpop.f32.mrf.mxu0 }
 0x161   : > { %v475_v5 = vadd.f32 %v1378_v48, %v474_v3  ;;  %784 = vmatmul.f32.gmra.mxu2 %v704_v1  ;;  %v904_v1 = vld [vmem:[%s1764_s7 + $0x48] sm:$0xff]  ;;  %v903_v3 = vld [vmem:[%s1764_s7 + $0x40] sm:$0xff] }
 0x162   : > { %v591_v7 = vpop.f32.mrf.mxu1 }
 0x163   : > { %v524_v8 = vmax.f32 %v475_v5, 0.0  ;;  %v592_v21 = vadd.f32 %v1511_v40, %v591_v7 }
 0x165   : > { %638 = vmatmul.f32.gmra.mxu1 %v524_v8  ;;  %v673_v16 = vadd.f32 %v592_v21, %v1292_v23  ;;  %v902_v21 = vld [vmem:[%s1764_s7 + $0x38] sm:$0xff] }
 0x167   : > { %v705_v9 = vmax.f32 %v673_v16, 0.0 }
 0x168   : > { %v477_v11 = vpop.f32.mrf.mxu0 }
 0x169   : > { %v478_v12 = vadd.f32 %v1378_v48, %v477_v11  ;;  %787 = vmatmul.f32.gmra.mxu2 %v705_v9  ;;  %v901_v11 = vld [vmem:[%s1764_s7 + $0x30] sm:$0xff] }
 0x16a   : > { %v594_v13 = vpop.f32.mrf.mxu1 }
 0x16b   : > { %v525_v25 = vmax.f32 %v478_v12, 0.0  ;;  %v595_v22 = vadd.f32 %v1511_v40, %v594_v13  ;;  %v900_v12 = vld [vmem:[%s1764_s7 + $0x28] sm:$0xff] }
 0x16d   : > { %641 = vmatmul.f32.gmra.mxu1 %v525_v25  ;;  %v674_v26 = vadd.f32 %v595_v22, %v1296_v24  ;;  %v910_v24 = vld [vmem:[%s1764_s7 + $0x78] sm:$0xff]  ;;  %v899_v25 = vld [vmem:[%s1764_s7 + $0x20] sm:$0xff] }
 0x16e   : > { %915 = vmatpush.msra.mxu3 %v910_v24 }
 0x16f   : > { %v706_v17 = vmax.f32 %v674_v26, 0.0 }
 0x170   : > { %v480_v29 = vpop.f32.mrf.mxu0  ;;  %916 = vmatpush.msra.mxu3 %v909_v52 }
 0x171   : > { %v481_v31 = vadd.f32 %v1378_v48, %v480_v29  ;;  %790 = vmatmul.f32.gmra.mxu2 %v706_v17  ;;  %v898_v29 = vld [vmem:[%s1764_s7 + $0x18] sm:$0xff] }
 0x172   : > { %v597_v34 = vpop.f32.mrf.mxu1  ;;  %917 = vmatpush.msra.mxu3 %v908_v53 }
 0x173   : > { %v526_v35 = vmax.f32 %v481_v31, 0.0  ;;  %v598_v23 = vadd.f32 %v1511_v40, %v597_v34 }
 0x174   : > { %918 = vmatpush.msra.mxu3 %v907_v55 }
 0x175   : > { %644 = vmatmul.f32.gmra.mxu1 %v526_v35  ;;  %v675_v37 = vadd.f32 %v598_v23, %v1309_v28  ;;  %v897_v35 = vld [vmem:[%s1764_s7 + $0x10] sm:$0xff] }
 0x176   : > { %919 = vmatpush.msra.mxu3 %v906_v60 }
 0x177   : > { %v707_v39 = vmax.f32 %v675_v37, 0.0  ;;  %v896_v37 = vld [vmem:[%s1764_s7 + $0x8] sm:$0xff] }
 0x178   : > { %v483_v18 = vpop.f32.mrf.mxu0  ;;  %920 = vmatpush.msra.mxu3 %v905_v20 }
 0x179   : > { %v484_v41 = vadd.f32 %v1378_v48, %v483_v18  ;;  %793 = vmatmul.f32.gmra.mxu2 %v707_v39  ;;  %v895_v39 = vld [vmem:[%s1764_s7] sm:$0xff] }
 0x17a   : > { %v600_v44 = vpop.f32.mrf.mxu1  ;;  %921 = vmatpush.msra.mxu3 %v904_v1 }
 0x17b   : > { %v527_v49 = vmax.f32 %v484_v41, 0.0  ;;  %v601_v51 = vadd.f32 %v1511_v40, %v600_v44 }
 0x17c   : > { %922 = vmatpush.msra.mxu3 %v903_v3 }
 0x17d   : > { %647 = vmatmul.f32.gmra.mxu1 %v527_v49  ;;  %v676_v28 = vadd.f32 %v601_v51, %v1325_v33 }
 0x17e   : > { %923 = vmatpush.msra.mxu3 %v902_v21 }
 0x17f   : > { %v708_v19 = vmax.f32 %v676_v28, 0.0 }
 0x180   : > { %v486_v56 = vpop.f32.mrf.mxu0  ;;  %924 = vmatpush.msra.mxu3 %v901_v11 }
 0x181   : > { %v487_v59 = vadd.f32 %v1378_v48, %v486_v56  ;;  %796 = vmatmul.f32.gmra.mxu2 %v708_v19 }
 0x182   : > { %v603_v33 = vpop.f32.mrf.mxu1  ;;  %925 = vmatpush.msra.mxu3 %v900_v12 }
 0x183   : > { %v528_v61 = vmax.f32 %v487_v59, 0.0  ;;  %v604_v63 = vadd.f32 %v1511_v40, %v603_v33 }
 0x184   : > { %926 = vmatpush.msra.mxu3 %v899_v25 }
 0x185   : > { %650 = vmatmul.f32.gmra.mxu1 %v528_v61  ;;  %v677_v0 = vadd.f32 %v604_v63, %v1341_v38 }
 0x186   : > { %927 = vmatpush.msra.mxu3 %v898_v29 }
 0x187   : > { %v709_v5 = vmax.f32 %v677_v0, 0.0 }
 0x188   : > { %v489_v7 = vpop.f32.mrf.mxu0  ;;  %928 = vmatpush.msra.mxu3 %v897_v35 }
 0x189   : > { %v490_v8 = vadd.f32 %v1378_v48, %v489_v7  ;;  %799 = vmatmul.f32.gmra.mxu2 %v709_v5 }
 0x18a   : > { %v606_v38 = vpop.f32.mrf.mxu1  ;;  %929 = vmatpush.msra.mxu3 %v896_v37 }
 0x18b   : > { %v529_v16 = vmax.f32 %v490_v8, 0.0  ;;  %v607_v9 = vadd.f32 %v1511_v40, %v606_v38 }
 0x18c   : > { %930 = vmatpush.msra.mxu3 %v895_v39 }
 0x18d   : > { %653 = vmatmul.f32.gmra.mxu1 %v529_v16  ;;  %v678_v13 = vadd.f32 %v607_v9, %v1354_v42 }
 0x18f   : > { %v710_v22 = vmax.f32 %v678_v13, 0.0 }
 0x190   : > { %v492_v26 = vpop.f32.mrf.mxu0 }
 0x191   : > { %v493_v17 = vadd.f32 %v1378_v48, %v492_v26  ;;  %802 = vmatmul.f32.gmra.mxu2 %v710_v22 }
 0x192   : > { %v609_v31 = vpop.f32.mrf.mxu1 }
 0x193   : > { %v530_v34 = vmax.f32 %v493_v17, 0.0  ;;  %v610_v42 = vadd.f32 %v1511_v40, %v609_v31 }
 0x195   : > { %656 = vmatmul.f32.gmra.mxu1 %v530_v34  ;;  %v679_v23 = vadd.f32 %v610_v42, %v1364_v45 }
 0x197   : > { %v711_v18 = vmax.f32 %v679_v23, 0.0 }
 0x198   : > { %v495_v41 = vpop.f32.mrf.mxu0 }
 0x199   : > { %v496_v24 = vadd.f32 %v1378_v48, %v495_v41  ;;  %805 = vmatmul.f32.gmra.mxu2 %v711_v18 }
 0x19a   : > { %v612_v44 = vpop.f32.mrf.mxu1 }
 0x19b   : > { %v531_v49 = vmax.f32 %v496_v24, 0.0  ;;  %v613_v51 = vadd.f32 %v1511_v40, %v612_v44 }
 0x19d   : > { %659 = vmatmul.f32.gmra.mxu1 %v531_v49  ;;  %v680_v45 = vadd.f32 %v613_v51, %v1368_v46 }
 0x19f   : > { %v712_v52 = vmax.f32 %v680_v45, 0.0 }
 0x1a0   : > { %v498_v28 = vpop.f32.mrf.mxu0 }
 0x1a1   : > { %v499_v53 = vadd.f32 %v1378_v48, %v498_v28  ;;  %808 = vmatmul.f32.gmra.mxu2 %v712_v52  ;;  %v1614_v48 = vld [vmem:[%s1763_s6] ss:$0 sm:$0xff] }
 0x1a2   : > { %v615_v19 = vpop.f32.mrf.mxu1 }
 0x1a3   : > { %v532_v55 = vmax.f32 %v499_v53, 0.0  ;;  %v616_v56 = vadd.f32 %v1511_v40, %v615_v19 }
 0x1a5   : > { %662 = vmatmul.f32.gmra.mxu1 %v532_v55  ;;  %v681_v59 = vadd.f32 %v616_v56, %v1372_v47 }
 0x1a7   : > { %v713_v60 = vmax.f32 %v681_v59, 0.0 }
 0x1a9   : > { %811 = vmatmul.f32.gmra.mxu2 %v713_v60 }
 0x1aa   : > { %v618_v33 = vpop.f32.mrf.mxu1 }
 0x1ab   : > { %v619_v61 = vadd.f32 %v1511_v40, %v618_v33 }
 0x1ad   : > { %v682_v63 = vadd.f32 %v619_v61, %v1381_v50 }
 0x1af   : > { %v714_v46 = vmax.f32 %v682_v63, 0.0 }
 0x1b1   : > { %814 = vmatmul.f32.gmra.mxu2 %v714_v46 }
 0x1b2   : > { %v621_v20 = vpop.f32.mrf.mxu1 }
 0x1b3   : > { %v622_v0 = vadd.f32 %v1511_v40, %v621_v20 }
 0x1b4   : > { %v767_v1 = vpop.f32.mrf.mxu2 }
 0x1b5   : > { %v768_v47 = vadd.f32 %v1614_v48, %v767_v1  ;;  %v683_v3 = vadd.f32 %v622_v0, %v1386_v54 }
 0x1b7   : > { %v715_v5 = vmax.f32 %v683_v3, 0.0  ;;  %v863_v7 = vmax.f32 %v768_v47, 0.0 }
 0x1b9   : > { %817 = vmatmul.f32.gmra.mxu2 %v715_v5  ;;  %931 = vmatmul.f32.vlgmr.msra.gmra.mxu3 %v863_v7 }
 0x1ba   : > { %v624_v50 = vpop.f32.mrf.mxu1 }
 0x1bb   : > { %v625_v8 = vadd.f32 %v1511_v40, %v624_v50 }
 0x1bc   : > { %v770_v21 = vpop.f32.mrf.mxu2 }
 0x1bd   : > { %v771_v38 = vadd.f32 %v1614_v48, %v770_v21  ;;  %v684_v16 = vadd.f32 %v625_v8, %v1391_v58 }
 0x1bf   : > { %v716_v9 = vmax.f32 %v684_v16, 0.0  ;;  %v864_v11 = vmax.f32 %v771_v38, 0.0 }
 0x1c1   : > { %820 = vmatmul.f32.gmra.mxu2 %v716_v9  ;;  %934 = vmatmul.f32.gmra.mxu3 %v864_v11 }
 0x1c2   : > { %v627_v12 = vpop.f32.mrf.mxu1 }
 0x1c3   : > { %v628_v13 = vadd.f32 %v1511_v40, %v627_v12 }
 0x1c4   : > { %v773_v54 = vpop.f32.mrf.mxu2 }
 0x1c5   : > { %v774_v25 = vadd.f32 %v1614_v48, %v773_v54  ;;  %v685_v22 = vadd.f32 %v628_v13, %v1396_v62 }
 0x1c7   : > { %v717_v26 = vmax.f32 %v685_v22, 0.0  ;;  %v865_v17 = vmax.f32 %v774_v25, 0.0 }
 0x1c9   : > { %823 = vmatmul.f32.gmra.mxu2 %v717_v26  ;;  %937 = vmatmul.f32.gmra.mxu3 %v865_v17 }
 0x1ca   : > { %v630_v29 = vpop.f32.mrf.mxu1 }
 0x1cb   : > { %v631_v31 = vadd.f32 %v1511_v40, %v630_v29 }
 0x1cc   : > { %v776_v58 = vpop.f32.mrf.mxu2 }
 0x1cd   : > { %v777_v34 = vadd.f32 %v1614_v48, %v776_v58  ;;  %v686_v42 = vadd.f32 %v631_v31, %v1401_v2 }
 0x1cf   : > { %v718_v35 = vmax.f32 %v686_v42, 0.0  ;;  %v866_v23 = vmax.f32 %v777_v34, 0.0 }
 0x1d1   : > { %826 = vmatmul.f32.gmra.mxu2 %v718_v35  ;;  %940 = vmatmul.f32.gmra.mxu3 %v866_v23 }
 0x1d2   : > { %v633_v37 = vpop.f32.mrf.mxu1 }
 0x1d3   : > { %v634_v39 = vadd.f32 %v1511_v40, %v633_v37 }
 0x1d4   : > { %v779_v62 = vpop.f32.mrf.mxu2 }
 0x1d5   : > { %v780_v18 = vadd.f32 %v1614_v48, %v779_v62  ;;  %v687_v41 = vadd.f32 %v634_v39, %v1406_v6 }
 0x1d7   : > { %v719_v24 = vmax.f32 %v687_v41, 0.0  ;;  %v867_v44 = vmax.f32 %v780_v18, 0.0 }
 0x1d9   : > { %829 = vmatmul.f32.gmra.mxu2 %v719_v24  ;;  %943 = vmatmul.f32.gmra.mxu3 %v867_v44 }
 0x1da   : > { %v636_v49 = vpop.f32.mrf.mxu1 }
 0x1db   : > { %v637_v51 = vadd.f32 %v1511_v40, %v636_v49 }
 0x1dc   : > { %v782_v2 = vpop.f32.mrf.mxu2 }
 0x1dd   : > { %v783_v45 = vadd.f32 %v1614_v48, %v782_v2  ;;  %v688_v52 = vadd.f32 %v637_v51, %v1411_v10 }
 0x1df   : > { %v720_v28 = vmax.f32 %v688_v52, 0.0  ;;  %v868_v53 = vmax.f32 %v783_v45, 0.0 }
 0x1e1   : > { %832 = vmatmul.f32.gmra.mxu2 %v720_v28  ;;  %946 = vmatmul.f32.gmra.mxu3 %v868_v53 }
 0x1e2   : > { %v639_v19 = vpop.f32.mrf.mxu1 }
 0x1e3   : > { %v640_v55 = vadd.f32 %v1511_v40, %v639_v19 }
 0x1e4   : > { %v785_v6 = vpop.f32.mrf.mxu2 }
 0x1e5   : > { %v786_v56 = vadd.f32 %v1614_v48, %v785_v6  ;;  %v689_v59 = vadd.f32 %v640_v55, %v1416_v14 }
 0x1e7   : > { %v721_v60 = vmax.f32 %v689_v59, 0.0  ;;  %v869_v33 = vmax.f32 %v786_v56, 0.0 }
 0x1e9   : > { %835 = vmatmul.f32.gmra.mxu2 %v721_v60  ;;  %949 = vmatmul.f32.gmra.mxu3 %v869_v33 }
 0x1ea   : > { %v642_v61 = vpop.f32.mrf.mxu1 }
 0x1eb   : > { %v643_v63 = vadd.f32 %v1511_v40, %v642_v61 }
 0x1ec   : > { %v788_v10 = vpop.f32.mrf.mxu2 }
 0x1ed   : > { %v690_v46 = vadd.f32 %v643_v63, %v1421_v27  ;;  %v789_v20 = vadd.f32 %v1614_v48, %v788_v10 }
 0x1ef   : > { %v722_v0 = vmax.f32 %v690_v46, 0.0  ;;  %v870_v1 = vmax.f32 %v789_v20, 0.0 }
 0x1f1   : > { %838 = vmatmul.f32.gmra.mxu2 %v722_v0  ;;  %952 = vmatmul.f32.gmra.mxu3 %v870_v1 }
 0x1f2   : > { %v645_v47 = vpop.f32.mrf.mxu1 }
 0x1f3   : > { %v646_v3 = vadd.f32 %v1511_v40, %v645_v47 }
 0x1f4   : > { %v791_v14 = vpop.f32.mrf.mxu2 }
 0x1f5   : > { %v691_v5 = vadd.f32 %v646_v3, %v1426_v32  ;;  %v792_v7 = vadd.f32 %v1614_v48, %v791_v14 }
 0x1f7   : > { %v723_v50 = vmax.f32 %v691_v5, 0.0  ;;  %v871_v8 = vmax.f32 %v792_v7, 0.0 }
 0x1f9   : > { %841 = vmatmul.f32.gmra.mxu2 %v723_v50  ;;  %955 = vmatmul.f32.gmra.mxu3 %v871_v8 }
 0x1fa   : > { %v648_v21 = vpop.f32.mrf.mxu1 }
 0x1fb   : > { %v649_v27 = vadd.f32 %v1511_v40, %v648_v21 }
 0x1fc   : > { %v794_v38 = vpop.f32.mrf.mxu2 }
 0x1fd   : > { %v692_v16 = vadd.f32 %v649_v27, %v1443_v43  ;;  %v795_v9 = vadd.f32 %v1614_v48, %v794_v38 }
 0x1ff   : > { %v724_v11 = vmax.f32 %v692_v16, 0.0  ;;  %v872_v12 = vmax.f32 %v795_v9, 0.0 }
 0x201   : > { %844 = vmatmul.f32.gmra.mxu2 %v724_v11  ;;  %958 = vmatmul.f32.gmra.mxu3 %v872_v12 }
 0x202   : > { %v651_v13 = vpop.f32.mrf.mxu1 }
 0x203   : > { %v652_v32 = vadd.f32 %v1511_v40, %v651_v13 }
 0x204   : > { %v797_v54 = vpop.f32.mrf.mxu2 }
 0x205   : > { %v693_v25 = vadd.f32 %v652_v32, %v1460_v57  ;;  %v798_v22 = vadd.f32 %v1614_v48, %v797_v54 }
 0x207   : > { %v725_v26 = vmax.f32 %v693_v25, 0.0  ;;  %v873_v17 = vmax.f32 %v798_v22, 0.0 }
 0x209   : > { %847 = vmatmul.f32.gmra.mxu2 %v725_v26  ;;  %961 = vmatmul.f32.gmra.mxu3 %v873_v17 }
 0x20a   : > { %v654_v29 = vpop.f32.mrf.mxu1 }
 0x20b   : > { %v655_v43 = vadd.f32 %v1511_v40, %v654_v29 }
 0x20c   : > { %v800_v31 = vpop.f32.mrf.mxu2 }
 0x20d   : > { %v694_v58 = vadd.f32 %v655_v43, %v1477_v4  ;;  %v801_v34 = vadd.f32 %v1614_v48, %v800_v31 }
 0x20f   : > { %v726_v42 = vmax.f32 %v694_v58, 0.0  ;;  %v874_v35 = vmax.f32 %v801_v34, 0.0 }
 0x211   : > { %850 = vmatmul.f32.gmra.mxu2 %v726_v42  ;;  %964 = vmatmul.f32.gmra.mxu3 %v874_v35 }
 0x212   : > { %v657_v23 = vpop.f32.mrf.mxu1 }
 0x213   : > { %v658_v57 = vadd.f32 %v1511_v40, %v657_v23 }
 0x214   : > { %v803_v37 = vpop.f32.mrf.mxu2 }
 0x215   : > { %v695_v39 = vadd.f32 %v658_v57, %v1494_v15  ;;  %v804_v62 = vadd.f32 %v1614_v48, %v803_v37 }
 0x217   : > { %v727_v18 = vmax.f32 %v695_v39, 0.0  ;;  %v875_v41 = vmax.f32 %v804_v62, 0.0 }
 0x219   : > { %853 = vmatmul.f32.gmra.mxu2 %v727_v18  ;;  %967 = vmatmul.f32.gmra.mxu3 %v875_v41 }
 0x21a   : > { %v660_v24 = vpop.f32.mrf.mxu1 }
 0x21b   : > { %v661_v4 = vadd.f32 %v1511_v40, %v660_v24 }
 0x21c   : > { %v806_v44 = vpop.f32.mrf.mxu2 }
 0x21d   : > { %v696_v49 = vadd.f32 %v661_v4, %v1499_v30  ;;  %v807_v51 = vadd.f32 %v1614_v48, %v806_v44 }
 0x21f   : > { %v728_v2 = vmax.f32 %v696_v49, 0.0  ;;  %v876_v45 = vmax.f32 %v807_v51, 0.0 }
 0x221   : > { %856 = vmatmul.f32.gmra.mxu2 %v728_v2  ;;  %970 = vmatmul.f32.gmra.mxu3 %v876_v45 }
 0x222   : > { %v663_v52 = vpop.f32.mrf.mxu1 }
 0x223   : > { %v664_v15 = vadd.f32 %v1511_v40, %v663_v52 }
 0x224   : > { %v809_v28 = vpop.f32.mrf.mxu2 }
 0x225   : > { %v697_v53 = vadd.f32 %v664_v15, %v1504_v36  ;;  %v810_v19 = vadd.f32 %v1614_v48, %v809_v28  ;;  %v1666_v36 = vld [vmem:[%s1765_s8] ss:$0 sm:$0xff] }
 0x227   : > { %v729_v55 = vmax.f32 %v697_v53, 0.0  ;;  %v877_v6 = vmax.f32 %v810_v19, 0.0 }
 0x229   : > { %859 = vmatmul.f32.gmra.mxu2 %v729_v55  ;;  %973 = vmatmul.f32.gmra.mxu3 %v877_v6 }
 0x22c   : > { %v812_v30 = vpop.f32.mrf.mxu2 }
 0x22d   : > { %v813_v56 = vadd.f32 %v1614_v48, %v812_v30 }
 0x22f   : > { %v878_v59 = vmax.f32 %v813_v56, 0.0 }
 0x231   : > { %976 = vmatmul.f32.gmra.mxu3 %v878_v59 }
 0x234   : > { %v815_v60 = vpop.f32.mrf.mxu2 }
 0x235   : > { %v816_v33 = vadd.f32 %v1614_v48, %v815_v60 }
 0x237   : > { %v879_v61 = vmax.f32 %v816_v33, 0.0 }
 0x239   : > { %979 = vmatmul.f32.gmra.mxu3 %v879_v61 }
 0x23c   : > { %v818_v40 = vpop.f32.mrf.mxu2  ;;  %v932_v63 = vpop.f32.mrf.mxu3 }
 0x23d   : > { %v819_v10 = vadd.f32 %v1614_v48, %v818_v40  ;;  %v933_v46 = vadd.f32 %v1666_v36, %v932_v63 }
 0x23f   : > { %v880_v20 = vmax.f32 %v819_v10, 0.0  ;;  %1028 = vst [vmem:[%s1673_s11] sm:$0xff] %v933_v46 }
 0x241   : > { %982 = vmatmul.f32.gmra.mxu3 %v880_v20 }
 0x244   : > { %v821_v0 = vpop.f32.mrf.mxu2  ;;  %v935_v1 = vpop.f32.mrf.mxu3 }
 0x245   : > { %v822_v47 = vadd.f32 %v1614_v48, %v821_v0  ;;  %v936_v3 = vadd.f32 %v1666_v36, %v935_v1 }
 0x247   : > { %v881_v14 = vmax.f32 %v822_v47, 0.0  ;;  %1029 = vst [vmem:[%s1673_s11 + $0x8] sm:$0xff] %v936_v3 }
 0x249   : > { %985 = vmatmul.f32.gmra.mxu3 %v881_v14 }
 0x24c   : > { %v824_v5 = vpop.f32.mrf.mxu2  ;;  %v938_v7 = vpop.f32.mrf.mxu3 }
 0x24d   : > { %v825_v50 = vadd.f32 %v1614_v48, %v824_v5  ;;  %v939_v8 = vadd.f32 %v1666_v36, %v938_v7 }
 0x24f   : > { %v882_v21 = vmax.f32 %v825_v50, 0.0  ;;  %1030 = vst [vmem:[%s1673_s11 + $0x10] sm:$0xff] %v939_v8 }
 0x251   : > { %988 = vmatmul.f32.gmra.mxu3 %v882_v21 }
 0x254   : > { %v827_v27 = vpop.f32.mrf.mxu2  ;;  %v941_v38 = vpop.f32.mrf.mxu3 }
 0x255   : > { %v828_v16 = vadd.f32 %v1614_v48, %v827_v27  ;;  %v942_v9 = vadd.f32 %v1666_v36, %v941_v38 }
 0x257   : > { %v883_v11 = vmax.f32 %v828_v16, 0.0  ;;  %1031 = vst [vmem:[%s1673_s11 + $0x18] sm:$0xff] %v942_v9 }
 0x259   : > { %991 = vmatmul.f32.gmra.mxu3 %v883_v11 }
 0x25c   : > { %v830_v12 = vpop.f32.mrf.mxu2  ;;  %v944_v13 = vpop.f32.mrf.mxu3 }
 0x25d   : > { %v831_v32 = vadd.f32 %v1614_v48, %v830_v12  ;;  %v945_v54 = vadd.f32 %v1666_v36, %v944_v13 }
 0x25f   : > { %v884_v25 = vmax.f32 %v831_v32, 0.0  ;;  %1032 = vst [vmem:[%s1673_s11 + $0x20] sm:$0xff] %v945_v54 }
 0x261   : > { %994 = vmatmul.f32.gmra.mxu3 %v884_v25 }
 0x264   : > { %v833_v22 = vpop.f32.mrf.mxu2  ;;  %v947_v26 = vpop.f32.mrf.mxu3 }
 0x265   : > { %v834_v17 = vadd.f32 %v1614_v48, %v833_v22  ;;  %v948_v29 = vadd.f32 %v1666_v36, %v947_v26 }
 0x267   : > { %v885_v43 = vmax.f32 %v834_v17, 0.0  ;;  %1033 = vst [vmem:[%s1673_s11 + $0x28] sm:$0xff] %v948_v29 }
 0x269   : > { %997 = vmatmul.f32.gmra.mxu3 %v885_v43 }
 0x26c   : > { %v836_v31 = vpop.f32.mrf.mxu2  ;;  %v950_v58 = vpop.f32.mrf.mxu3 }
 0x26d   : > { %v837_v34 = vadd.f32 %v1614_v48, %v836_v31  ;;  %v951_v42 = vadd.f32 %v1666_v36, %v950_v58 }
 0x26f   : > { %v886_v35 = vmax.f32 %v837_v34, 0.0  ;;  %1034 = vst [vmem:[%s1673_s11 + $0x30] sm:$0xff] %v951_v42 }
 0x271   : > { %1000 = vmatmul.f32.gmra.mxu3 %v886_v35 }
 0x274   : > { %v839_v23 = vpop.f32.mrf.mxu2  ;;  %v953_v57 = vpop.f32.mrf.mxu3 }
 0x275   : > { %v840_v37 = vadd.f32 %v1614_v48, %v839_v23  ;;  %v954_v39 = vadd.f32 %v1666_v36, %v953_v57 }
 0x277   : > { %v887_v62 = vmax.f32 %v840_v37, 0.0  ;;  %1035 = vst [vmem:[%s1673_s11 + $0x38] sm:$0xff] %v954_v39 }
 0x279   : > { %1003 = vmatmul.f32.gmra.mxu3 %v887_v62 }
 0x27c   : > { %v842_v18 = vpop.f32.mrf.mxu2  ;;  %v956_v41 = vpop.f32.mrf.mxu3 }
 0x27d   : > { %v843_v24 = vadd.f32 %v1614_v48, %v842_v18  ;;  %v957_v4 = vadd.f32 %v1666_v36, %v956_v41 }
 0x27f   : > { %v888_v44 = vmax.f32 %v843_v24, 0.0  ;;  %1036 = vst [vmem:[%s1673_s11 + $0x40] sm:$0xff] %v957_v4 }
 0x281   : > { %1006 = vmatmul.f32.gmra.mxu3 %v888_v44 }
 0x284   : > { %v845_v49 = vpop.f32.mrf.mxu2  ;;  %v959_v51 = vpop.f32.mrf.mxu3 }
 0x285   : > { %v846_v2 = vadd.f32 %v1614_v48, %v845_v49  ;;  %v960_v45 = vadd.f32 %v1666_v36, %v959_v51 }
 0x287   : > { %v889_v52 = vmax.f32 %v846_v2, 0.0  ;;  %1037 = vst [vmem:[%s1673_s11 + $0x48] sm:$0xff] %v960_v45 }
 0x289   : > { %1009 = vmatmul.f32.gmra.mxu3 %v889_v52 }
 0x28c   : > { %v848_v15 = vpop.f32.mrf.mxu2  ;;  %v962_v28 = vpop.f32.mrf.mxu3 }
 0x28d   : > { %v849_v53 = vadd.f32 %v1614_v48, %v848_v15  ;;  %v963_v19 = vadd.f32 %v1666_v36, %v962_v28 }
 0x28f   : > { %v890_v55 = vmax.f32 %v849_v53, 0.0  ;;  %1038 = vst [vmem:[%s1673_s11 + $0x50] sm:$0xff] %v963_v19 }
 0x291   : > { %1012 = vmatmul.f32.gmra.mxu3 %v890_v55 }
 0x294   : > { %v851_v6 = vpop.f32.mrf.mxu2  ;;  %v965_v30 = vpop.f32.mrf.mxu3 }
 0x295   : > { %v852_v56 = vadd.f32 %v1614_v48, %v851_v6  ;;  %v966_v59 = vadd.f32 %v1666_v36, %v965_v30 }
 0x297   : > { %v891_v60 = vmax.f32 %v852_v56, 0.0  ;;  %1039 = vst [vmem:[%s1673_s11 + $0x58] sm:$0xff] %v966_v59 }
 0x299   : > { %1015 = vmatmul.f32.gmra.mxu3 %v891_v60 }
 0x29c   : > { %v854_v33 = vpop.f32.mrf.mxu2  ;;  %v968_v61 = vpop.f32.mrf.mxu3 }
 0x29d   : > { %v855_v40 = vadd.f32 %v1614_v48, %v854_v33  ;;  %v969_v63 = vadd.f32 %v1666_v36, %v968_v61 }
 0x29f   : > { %v892_v10 = vmax.f32 %v855_v40, 0.0  ;;  %1040 = vst [vmem:[%s1673_s11 + $0x60] sm:$0xff] %v969_v63 }
 0x2a1   : > { %1018 = vmatmul.f32.gmra.mxu3 %v892_v10 }
 0x2a4   : > { %v857_v46 = vpop.f32.mrf.mxu2  ;;  %v971_v20 = vpop.f32.mrf.mxu3 }
 0x2a5   : > { %v858_v0 = vadd.f32 %v1614_v48, %v857_v46  ;;  %v972_v1 = vadd.f32 %v1666_v36, %v971_v20 }
 0x2a7   : > { %v893_v47 = vmax.f32 %v858_v0, 0.0  ;;  %1041 = vst [vmem:[%s1673_s11 + $0x68] sm:$0xff] %v972_v1 }
 0x2a9   : > { %1021 = vmatmul.f32.gmra.mxu3 %v893_v47 }
 0x2ac   : > { %v860_v3 = vpop.f32.mrf.mxu2  ;;  %v974_v14 = vpop.f32.mrf.mxu3 }
 0x2ad   : > { %v861_v5 = vadd.f32 %v1614_v48, %v860_v3  ;;  %v975_v7 = vadd.f32 %v1666_v36, %v974_v14 }
 0x2af   : > { %v894_v50 = vmax.f32 %v861_v5, 0.0  ;;  %1042 = vst [vmem:[%s1673_s11 + $0x70] sm:$0xff] %v975_v7 }
 0x2b1   : > { %1024 = vmatmul.f32.gmra.mxu3 %v894_v50 }
 0x2b4   : > { %v977_v8 = vpop.f32.mrf.mxu3 }
 0x2b5   : > { %v978_v21 = vadd.f32 %v1666_v36, %v977_v8 }
 0x2b7   : > { %1043 = vst [vmem:[%s1673_s11 + $0x78] sm:$0xff] %v978_v21 }
 0x2bc   : > { %v980_v27 = vpop.f32.mrf.mxu3 }
 0x2bd   : > { %v981_v38 = vadd.f32 %v1666_v36, %v980_v27 }
 0x2bf   : > { %1044 = vst [vmem:[%s1673_s11 + $0x80] sm:$0xff] %v981_v38 }
 0x2c4   : > { %v983_v16 = vpop.f32.mrf.mxu3 }
 0x2c5   : > { %v984_v48 = vadd.f32 %v1666_v36, %v983_v16 }
 0x2c7   : > { %1045 = vst [vmem:[%s1673_s11 + $0x88] sm:$0xff] %v984_v48 }
 0x2cc   : > { %v986_v9 = vpop.f32.mrf.mxu3 }
 0x2cd   : > { %v987_v11 = vadd.f32 %v1666_v36, %v986_v9 }
 0x2cf   : > { %1046 = vst [vmem:[%s1673_s11 + $0x90] sm:$0xff] %v987_v11 }
 0x2d4   : > { %v989_v12 = vpop.f32.mrf.mxu3 }
 0x2d5   : > { %v990_v13 = vadd.f32 %v1666_v36, %v989_v12 }
 0x2d7   : > { %1047 = vst [vmem:[%s1673_s11 + $0x98] sm:$0xff] %v990_v13 }
 0x2dc   : > { %v992_v32 = vpop.f32.mrf.mxu3 }
 0x2dd   : > { %v993_v54 = vadd.f32 %v1666_v36, %v992_v32 }
 0x2df   : > { %1048 = vst [vmem:[%s1673_s11 + $0xa0] sm:$0xff] %v993_v54 }
 0x2e4   : > { %v995_v25 = vpop.f32.mrf.mxu3 }
 0x2e5   : > { %v996_v22 = vadd.f32 %v1666_v36, %v995_v25 }
 0x2e7   : > { %1049 = vst [vmem:[%s1673_s11 + $0xa8] sm:$0xff] %v996_v22 }
 0x2ec   : > { %v998_v26 = vpop.f32.mrf.mxu3 }
 0x2ed   : > { %v999_v17 = vadd.f32 %v1666_v36, %v998_v26 }
 0x2ef   : > { %1050 = vst [vmem:[%s1673_s11 + $0xb0] sm:$0xff] %v999_v17 }
 0x2f4   : > { %v1001_v29 = vpop.f32.mrf.mxu3 }
 0x2f5   : > { %v1002_v43 = vadd.f32 %v1666_v36, %v1001_v29 }
 0x2f7   : > { %1051 = vst [vmem:[%s1673_s11 + $0xb8] sm:$0xff] %v1002_v43 }
 0x2fc   : > { %v1004_v31 = vpop.f32.mrf.mxu3 }
 0x2fd   : > { %v1005_v58 = vadd.f32 %v1666_v36, %v1004_v31 }
 0x2ff   : > { %1052 = vst [vmem:[%s1673_s11 + $0xc0] sm:$0xff] %v1005_v58 }
 0x304   : > { %v1007_v34 = vpop.f32.mrf.mxu3 }
 0x305   : > { %v1008_v42 = vadd.f32 %v1666_v36, %v1007_v34 }
 0x307   : > { %1053 = vst [vmem:[%s1673_s11 + $0xc8] sm:$0xff] %v1008_v42 }
 0x30c   : > { %v1010_v35 = vpop.f32.mrf.mxu3 }
 0x30d   : > { %v1011_v23 = vadd.f32 %v1666_v36, %v1010_v35 }
 0x30f   : > { %1054 = vst [vmem:[%s1673_s11 + $0xd0] sm:$0xff] %v1011_v23 }
 0x314   : > { %v1013_v57 = vpop.f32.mrf.mxu3 }
 0x315   : > { %v1014_v37 = vadd.f32 %v1666_v36, %v1013_v57 }
 0x317   : > { %1055 = vst [vmem:[%s1673_s11 + $0xd8] sm:$0xff] %v1014_v37 }
 0x31c   : > { %v1016_v39 = vpop.f32.mrf.mxu3 }
 0x31d   : > { %v1017_v62 = vadd.f32 %v1666_v36, %v1016_v39 }
 0x31f   : > { %1056 = vst [vmem:[%s1673_s11 + $0xe0] sm:$0xff] %v1017_v62 }
 0x324   : > { %v1019_v18 = vpop.f32.mrf.mxu3 }
 0x325   : > { %v1020_v41 = vadd.f32 %v1666_v36, %v1019_v18 }
 0x327   : > { %1057 = vst [vmem:[%s1673_s11 + $0xe8] sm:$0xff] %v1020_v41 }
 0x32c   : > { %v1022_v24 = vpop.f32.mrf.mxu3 }
 0x32d   : > { %v1023_v4 = vadd.f32 %v1666_v36, %v1022_v24 }
 0x32f   : > { %1058 = vst [vmem:[%s1673_s11 + $0xf0] sm:$0xff] %v1023_v4 }
 0x334   : > { %v1025_v44 = vpop.f32.mrf.mxu3 }
 0x335   : > { %v1026_v49 = vadd.f32 %v1666_v36, %v1025_v44 }
 0x337   : > { %1059 = vst [vmem:[%s1673_s11 + $0xf8] sm:$0xff] %v1026_v49 }
 0x338 PF: > { %s19_s30 = sadd.s32 1, %s1145_s30  }
 0x339   : > { %p16_p4 = scmp.ge.s32.totalorder %s19_s30, 6  }
 0x33b   :  { %18 = sbr.rel (!%p16_p4) target bundleno = 1 (0x1), region = 86 }

// kernel: fwd.1
= control target key start
LH: loop header
LB: loop body
LE: loop exit
PB: predicated region body
PF: predicated region fallthrough
CT: control target
= control target key end

     0   :  { %s1197_s30 = smov 0   ;;  %s1757_s0 = inlined_call_operand.vmem [shape: f32[1024,128], index: 0, kind: input, shape index: {}]   ;;  %s1758_s1 = inlined_call_operand.vmem [shape: f32[128,128], index: 1, kind: input, shape index: {}]   ;;  %s1759_s2 = inlined_call_operand.vmem [shape: f32[1,128], index: 2, kind: input, shape index: {}]   ;;  %s1760_s3 = inlined_call_operand.vmem [shape: f32[128,128], index: 3, kind: input, shape index: {}]   ;;  %s1761_s4 = inlined_call_operand.vmem [shape: f32[1,128], index: 4, kind: input, shape index: {}]   ;;  %s1762_s5 = inlined_call_operand.vmem [shape: f32[128,128], index: 5, kind: input, shape index: {}]   ;;  %s1763_s6 = inlined_call_operand.vmem [shape: f32[1,128], index: 6, kind: input, shape index: {}]   ;;  %s1764_s7 = inlined_call_operand.vmem [shape: f32[128,128], index: 7, kind: input, shape index: {}]   ;;  %s1765_s8 = inlined_call_operand.vmem [shape: f32[1,128], index: 8, kind: input, shape index: {}]   ;;  %s1766_s9 = inlined_call_operand.vmem [shape: f32[1024,128], index: 9, kind: output, shape index: {}]  }
   0x1 LB: > { %s1116_s10 = sadd.s32 4294967295, %s1145_s30   ;;  %p1120_p0 = scmp.ge.s32.totalorder %s1145_s30, 1  ;;  %s1145_s30 = sphi %s1197_s30, %s19_s30  }
   0x2   : > { %p288_p1 = scmp.lt.s32.totalorder %s1145_s30, 5 }
   0x4   : > { %p289_p2 = pnand %p1120_p0, %p288_p1 }
   0x5   : > { %s1121_s27 = sshll.u32 (!%p289_p2), %s1116_s10, 5 }
   0x6   : > { %292 = sbr.rel (%p289_p2) target bundleno = 824 (0x338), region = 56  ;;  %p325_p3 = scmp.lt.s32.totalorder (!%p289_p2), %s1121_s27, 127 }
   0xb   : > { %v383_v0 = vld [vmem:[%s1758_s1 + $0x78] sm:$0xff]  ;;  %v382_v1 = vld [vmem:[%s1758_s1 + $0x70] sm:$0xff]  ;;  %v381_v2 = vld [vmem:[%s1758_s1 + $0x68] sm:$0xff]  ;;  %s1768_s27 = smov (!%p325_p3, %s1121_s27), 127 }
   0xc   : > { %388 = vmatpush.msra.mxu0 %v383_v0  ;;  %v380_v3 = vld [vmem:[%s1758_s1 + $0x60] sm:$0xff]  ;;  %v379_v4 = vld [vmem:[%s1758_s1 + $0x58] sm:$0xff]  ;;  %v378_v5 = vld [vmem:[%s1758_s1 + $0x50] sm:$0xff]  ;;  %s1122_s18 = sshll.u32 %s1768_s27, 3 }
   0xd   : > { %v377_v6 = vld [vmem:[%s1758_s1 + $0x48] sm:$0xff]  ;;  %v376_v7 = vld [vmem:[%s1758_s1 + $0x40] sm:$0xff]  ;;  %v375_v8 = vld [vmem:[%s1758_s1 + $0x38] sm:$0xff]  ;;  %s1258_s25 = scalar_lea.vmem %s1757_s0, %s1122_s18  ;;  %s1673_s11 = scalar_lea.vmem %s1766_s9, %s1122_s18 }
   0xe   : > { %389 = vmatpush.msra.mxu0 %v382_v1  ;;  %v374_v9 = vld [vmem:[%s1758_s1 + $0x30] sm:$0xff]  ;;  %v373_v10 = vld [vmem:[%s1758_s1 + $0x28] sm:$0xff]  ;;  %v372_v11 = vld [vmem:[%s1758_s1 + $0x20] sm:$0xff] }
   0xf   : > { %v371_v12 = vld [vmem:[%s1758_s1 + $0x18] sm:$0xff]  ;;  %v370_v13 = vld [vmem:[%s1758_s1 + $0x10] sm:$0xff]  ;;  %v369_v14 = vld [vmem:[%s1758_s1 + $0x8] sm:$0xff] }
  0x10   : > { %390 = vmatpush.msra.mxu0 %v381_v2  ;;  %v368_v15 = vld [vmem:[%s1758_s1] sm:$0xff]  ;;  %v1268_v17 = vld [vmem:[%s1258_s25 + $0x8] sm:$0xff]  ;;  %v1272_v18 = vld [vmem:[%s1258_s25 + $0x10] sm:$0xff] }
  0x11   : > { %v1264_v16 = vld [vmem:[%s1258_s25] sm:$0xff]  ;;  %v1276_v19 = vld [vmem:[%s1258_s25 + $0x18] sm:$0xff]  ;;  %v1284_v21 = vld [vmem:[%s1258_s25 + $0x28] sm:$0xff] }
  0x12   : > { %391 = vmatpush.msra.mxu0 %v380_v3  ;;  %v1280_v20 = vld [vmem:[%s1258_s25 + $0x20] sm:$0xff]  ;;  %v1288_v22 = vld [vmem:[%s1258_s25 + $0x30] sm:$0xff]  ;;  %v1292_v23 = vld [vmem:[%s1258_s25 + $0x38] sm:$0xff] }
  0x13   : > { %v1296_v24 = vld [vmem:[%s1258_s25 + $0x40] sm:$0xff]  ;;  %v548_v25 = vld [vmem:[%s1760_s3 + $0x78] sm:$0xff]  ;;  %v547_v26 = vld [vmem:[%s1760_s3 + $0x70] sm:$0xff] }
  0x14   : > { %392 = vmatpush.msra.mxu0 %v379_v4  ;;  %553 = vmatpush.msra.mxu1 %v548_v25  ;;  %v546_v27 = vld [vmem:[%s1760_s3 + $0x68] sm:$0xff]  ;;  %v545_v29 = vld [vmem:[%s1760_s3 + $0x60] sm:$0xff]  ;;  %v544_v30 = vld [vmem:[%s1760_s3 + $0x58] sm:$0xff] }
  0x15   : > { %v1309_v28 = vld [vmem:[%s1258_s25 + $0x48] sm:$0xff]  ;;  %v543_v31 = vld [vmem:[%s1760_s3 + $0x50] sm:$0xff]  ;;  %v541_v34 = vld [vmem:[%s1760_s3 + $0x40] sm:$0xff] }
  0x16   : > { %393 = vmatpush.msra.mxu0 %v378_v5  ;;  %554 = vmatpush.msra.mxu1 %v547_v26  ;;  %v542_v32 = vld [vmem:[%s1760_s3 + $0x48] sm:$0xff]  ;;  %v1325_v33 = vld [vmem:[%s1258_s25 + $0x50] sm:$0xff]  ;;  %v540_v35 = vld [vmem:[%s1760_s3 + $0x38] sm:$0xff] }
  0x17   : > { %v539_v36 = vld [vmem:[%s1760_s3 + $0x30] sm:$0xff]  ;;  %v538_v37 = vld [vmem:[%s1760_s3 + $0x28] sm:$0xff]  ;;  %v1341_v38 = vld [vmem:[%s1258_s25 + $0x58] sm:$0xff] }
  0x18   : > { %394 = vmatpush.msra.mxu0 %v377_v6  ;;  %555 = vmatpush.msra.mxu1 %v546_v27  ;;  %v537_v39 = vld [vmem:[%s1760_s3 + $0x20] sm:$0xff]  ;;  %v536_v40 = vld [vmem:[%s1760_s3 + $0x18] sm:$0xff]  ;;  %v535_v41 = vld [vmem:[%s1760_s3 + $0x10] sm:$0xff] }
  0x19   : > { %v1354_v42 = vld [vmem:[%s1258_s25 + $0x60] sm:$0xff]  ;;  %v534_v43 = vld [vmem:[%s1760_s3 + $0x8] sm:$0xff]  ;;  %v1368_v46 = vld [vmem:[%s1258_s25 + $0x70] sm:$0xff] }
  0x1a   : > { %395 = vmatpush.msra.mxu0 %v376_v7  ;;  %556 = vmatpush.msra.mxu1 %v545_v29  ;;  %v533_v44 = vld [vmem:[%s1760_s3] sm:$0xff]  ;;  %v1364_v45 = vld [vmem:[%s1258_s25 + $0x68] sm:$0xff]  ;;  %v1372_v47 = vld [vmem:[%s1258_s25 + $0x78] sm:$0xff] }
  0x1b   : > { %v1378_v48 = vld [vmem:[%s1759_s2] ss:$0 sm:$0xff]  ;;  %v1386_v54 = vld [vmem:[%s1258_s25 + $0x88] sm:$0xff]  ;;  %v1391_v58 = vld [vmem:[%s1258_s25 + $0x90] sm:$0xff] }
  0x1c   : > { %396 = vmatpush.msra.mxu0 %v375_v8  ;;  %557 = vmatpush.msra.mxu1 %v544_v30  ;;  %v1381_v50 = vld [vmem:[%s1258_s25 + $0x80] sm:$0xff]  ;;  %v1396_v62 = vld [vmem:[%s1258_s25 + $0x98] sm:$0xff]  ;;  %v1406_v6 = vld [vmem:[%s1258_s25 + $0xa8] sm:$0xff] }
  0x1d   : > { %v1401_v2 = vld [vmem:[%s1258_s25 + $0xa0] sm:$0xff] }
  0x1e   : > { %397 = vmatpush.msra.mxu0 %v374_v9  ;;  %558 = vmatpush.msra.mxu1 %v543_v31  ;;  %v1421_v27 = vld [vmem:[%s1258_s25 + $0xc0] sm:$0xff] }
  0x20   : > { %398 = vmatpush.msra.mxu0 %v373_v10  ;;  %559 = vmatpush.msra.mxu1 %v542_v32  ;;  %v1411_v10 = vld [vmem:[%s1258_s25 + $0xb0] sm:$0xff]  ;;  %v1426_v32 = vld [vmem:[%s1258_s25 + $0xc8] sm:$0xff] }
  0x22   : > { %399 = vmatpush.msra.mxu0 %v372_v11  ;;  %560 = vmatpush.msra.mxu1 %v541_v34 }
  0x24   : > { %400 = vmatpush.msra.mxu0 %v371_v12  ;;  %561 = vmatpush.msra.mxu1 %v540_v35  ;;  %v745_v35 = vld [vmem:[%s1762_s5 + $0x78] sm:$0xff] }
  0x25   : > { %750 = vmatpush.msra.mxu2 %v745_v35 }
  0x26   : > { %401 = vmatpush.msra.mxu0 %v370_v13  ;;  %562 = vmatpush.msra.mxu1 %v539_v36 }
  0x28   : > { %402 = vmatpush.msra.mxu0 %v369_v14  ;;  %563 = vmatpush.msra.mxu1 %v538_v37  ;;  %v1416_v14 = vld [vmem:[%s1258_s25 + $0xb8] sm:$0xff]  ;;  %v744_v37 = vld [vmem:[%s1762_s5 + $0x70] sm:$0xff] }
  0x29   : > { %751 = vmatpush.msra.mxu2 %v744_v37 }
  0x2a   : > { %403 = vmatpush.msra.mxu0 %v368_v15  ;;  %564 = vmatpush.msra.mxu1 %v537_v39  ;;  %v743_v39 = vld [vmem:[%s1762_s5 + $0x68] sm:$0xff] }
  0x2b   : > { %404 = vmatmul.f32.vlgmr.msra.gmra.mxu0 %v1264_v16  ;;  %752 = vmatpush.msra.mxu2 %v743_v39 }
  0x2c   : > { %565 = vmatpush.msra.mxu1 %v536_v40  ;;  %v742_v40 = vld [vmem:[%s1762_s5 + $0x60] sm:$0xff] }
  0x2d   : > { %753 = vmatpush.msra.mxu2 %v742_v40  ;;  %v1511_v40 = vld [vmem:[%s1761_s4] ss:$0 sm:$0xff] }
  0x2e   : > { %566 = vmatpush.msra.mxu1 %v535_v41 }
  0x30   : > { %567 = vmatpush.msra.mxu1 %v534_v43  ;;  %v1443_v43 = vld [vmem:[%s1258_s25 + $0xd0] sm:$0xff] }
  0x32   : > { %568 = vmatpush.msra.mxu1 %v533_v44 }
  0x33   : > { %407 = vmatmul.f32.gmra.mxu0 %v1268_v17 }
  0x3b   : > { %410 = vmatmul.f32.gmra.mxu0 %v1272_v18 }
  0x43   : > { %413 = vmatmul.f32.gmra.mxu0 %v1276_v19 }
  0x4b   : > { %416 = vmatmul.f32.gmra.mxu0 %v1280_v20 }
  0x53   : > { %419 = vmatmul.f32.gmra.mxu0 %v1284_v21 }
  0x5b   : > { %422 = vmatmul.f32.gmra.mxu0 %v1288_v22 }
  0x63   : > { %425 = vmatmul.f32.gmra.mxu0 %v1292_v23 }
  0x6b   : > { %428 = vmatmul.f32.gmra.mxu0 %v1296_v24 }
  0x73   : > { %431 = vmatmul.f32.gmra.mxu0 %v1309_v28 }
  0x7b   : > { %434 = vmatmul.f32.gmra.mxu0 %v1325_v33 }
  0x83   : > { %437 = vmatmul.f32.gmra.mxu0 %v1341_v38 }
  0x8b   : > { %440 = vmatmul.f32.gmra.mxu0 %v1354_v42 }
  0x93   : > { %443 = vmatmul.f32.gmra.mxu0 %v1364_v45 }
  0x9b   : > { %446 = vmatmul.f32.gmra.mxu0 %v1368_v46 }
  0xa3   : > { %449 = vmatmul.f32.gmra.mxu0 %v1372_v47 }
  0xa8   : > { %v405_v49 = vpop.f32.mrf.mxu0 }
  0xa9   : > { %v406_v51 = vadd.f32 %v1378_v48, %v405_v49  ;;  %v741_v49 = vld [vmem:[%s1762_s5 + $0x58] sm:$0xff] }
  0xaa   : > { %754 = vmatpush.msra.mxu2 %v741_v49 }
  0xab   : > { %452 = vmatmul.f32.gmra.mxu0 %v1381_v50  ;;  %v501_v52 = vmax.f32 %v406_v51, 0.0 }
  0xad   : > { %569 = vmatmul.f32.vlgmr.msra.gmra.mxu1 %v501_v52  ;;  %v740_v52 = vld [vmem:[%s1762_s5 + $0x50] sm:$0xff] }
  0xae   : > { %755 = vmatpush.msra.mxu2 %v740_v52 }
  0xb0   : > { %v408_v53 = vpop.f32.mrf.mxu0 }
  0xb1   : > { %v409_v55 = vadd.f32 %v1378_v48, %v408_v53  ;;  %v739_v53 = vld [vmem:[%s1762_s5 + $0x48] sm:$0xff] }
  0xb2   : > { %756 = vmatpush.msra.mxu2 %v739_v53 }
  0xb3   : > { %455 = vmatmul.f32.gmra.mxu0 %v1386_v54  ;;  %v502_v56 = vmax.f32 %v409_v55, 0.0  ;;  %v738_v55 = vld [vmem:[%s1762_s5 + $0x40] sm:$0xff] }
  0xb4   : > { %757 = vmatpush.msra.mxu2 %v738_v55 }
  0xb5   : > { %572 = vmatmul.f32.gmra.mxu1 %v502_v56 }
  0xb8   : > { %v411_v57 = vpop.f32.mrf.mxu0 }
  0xb9   : > { %v412_v59 = vadd.f32 %v1378_v48, %v411_v57  ;;  %v1460_v57 = vld [vmem:[%s1258_s25 + $0xd8] sm:$0xff] }
  0xbb   : > { %458 = vmatmul.f32.gmra.mxu0 %v1391_v58  ;;  %v503_v60 = vmax.f32 %v412_v59, 0.0 }
  0xbd   : > { %575 = vmatmul.f32.gmra.mxu1 %v503_v60  ;;  %v737_v60 = vld [vmem:[%s1762_s5 + $0x38] sm:$0xff] }
  0xbe   : > { %758 = vmatpush.msra.mxu2 %v737_v60 }
  0xc0   : > { %v414_v61 = vpop.f32.mrf.mxu0 }
  0xc1   : > { %v415_v63 = vadd.f32 %v1378_v48, %v414_v61 }
  0xc3   : > { %461 = vmatmul.f32.gmra.mxu0 %v1396_v62  ;;  %v504_v0 = vmax.f32 %v415_v63, 0.0  ;;  %v736_v63 = vld [vmem:[%s1762_s5 + $0x30] sm:$0xff] }
  0xc4   : > { %759 = vmatpush.msra.mxu2 %v736_v63 }
  0xc5   : > { %578 = vmatmul.f32.gmra.mxu1 %v504_v0  ;;  %v735_v0 = vld [vmem:[%s1762_s5 + $0x28] sm:$0xff] }
  0xc6   : > { %760 = vmatpush.msra.mxu2 %v735_v0 }
  0xc8   : > { %v417_v1 = vpop.f32.mrf.mxu0 }
  0xc9   : > { %v418_v3 = vadd.f32 %v1378_v48, %v417_v1  ;;  %v734_v1 = vld [vmem:[%s1762_s5 + $0x20] sm:$0xff] }
  0xca   : > { %761 = vmatpush.msra.mxu2 %v734_v1 }
  0xcb   : > { %464 = vmatmul.f32.gmra.mxu0 %v1401_v2  ;;  %v505_v4 = vmax.f32 %v418_v3, 0.0 }
  0xcd   : > { %581 = vmatmul.f32.gmra.mxu1 %v505_v4  ;;  %v1477_v4 = vld [vmem:[%s1258_s25 + $0xe0] sm:$0xff] }
  0xd0   : > { %v420_v5 = vpop.f32.mrf.mxu0 }
  0xd1   : > { %v421_v7 = vadd.f32 %v1378_v48, %v420_v5 }
  0xd3   : > { %467 = vmatmul.f32.gmra.mxu0 %v1406_v6  ;;  %v506_v8 = vmax.f32 %v421_v7, 0.0  ;;  %v733_v7 = vld [vmem:[%s1762_s5 + $0x18] sm:$0xff] }
  0xd4   : > { %762 = vmatpush.msra.mxu2 %v733_v7 }
  0xd5   : > { %584 = vmatmul.f32.gmra.mxu1 %v506_v8 }
  0xd8   : > { %v423_v9 = vpop.f32.mrf.mxu0 }
  0xd9   : > { %v424_v11 = vadd.f32 %v1378_v48, %v423_v9  ;;  %v732_v9 = vld [vmem:[%s1762_s5 + $0x10] sm:$0xff] }
  0xda   : > { %763 = vmatpush.msra.mxu2 %v732_v9 }
  0xdb   : > { %470 = vmatmul.f32.gmra.mxu0 %v1411_v10  ;;  %v507_v12 = vmax.f32 %v424_v11, 0.0  ;;  %v731_v11 = vld [vmem:[%s1762_s5 + $0x8] sm:$0xff] }
  0xdc   : > { %764 = vmatpush.msra.mxu2 %v731_v11 }
  0xdd   : > { %587 = vmatmul.f32.gmra.mxu1 %v507_v12  ;;  %v730_v12 = vld [vmem:[%s1762_s5] sm:$0xff] }
  0xde   : > { %765 = vmatpush.msra.mxu2 %v730_v12 }
  0xe0   : > { %v426_v13 = vpop.f32.mrf.mxu0 }
  0xe1   : > { %v427_v15 = vadd.f32 %v1378_v48, %v426_v13 }
  0xe3   : > { %473 = vmatmul.f32.gmra.mxu0 %v1416_v14  ;;  %v508_v25 = vmax.f32 %v427_v15, 0.0  ;;  %v1494_v15 = vld [vmem:[%s1258_s25 + $0xe8] sm:$0xff] }
  0xe5   : > { %590 = vmatmul.f32.gmra.mxu1 %v508_v25 }
  0xe8   : > { %v429_v26 = vpop.f32.mrf.mxu0 }
  0xe9   : > { %v430_v29 = vadd.f32 %v1378_v48, %v429_v26 }
  0xeb   : > { %v509_v30 = vmax.f32 %v430_v29, 0.0  ;;  %476 = vmatmul.f32.gmra.mxu0 %v1421_v27 }
  0xed   : > { %593 = vmatmul.f32.gmra.mxu1 %v509_v30  ;;  %v1499_v30 = vld [vmem:[%s1258_s25 + $0xf0] sm:$0xff] }
  0xf0   : > { %v432_v31 = vpop.f32.mrf.mxu0 }
  0xf1   : > { %v433_v34 = vadd.f32 %v1378_v48, %v432_v31 }
  0xf3   : > { %v510_v36 = vmax.f32 %v433_v34, 0.0  ;;  %479 = vmatmul.f32.gmra.mxu0 %v1426_v32 }
  0xf5   : > { %596 = vmatmul.f32.gmra.mxu1 %v510_v36  ;;  %v1504_v36 = vld [vmem:[%s1258_s25 + $0xf8] sm:$0xff] }
  0xf8   : > { %v435_v41 = vpop.f32.mrf.mxu0 }
  0xf9   : > { %v436_v44 = vadd.f32 %v1378_v48, %v435_v41 }
  0xfb   : > { %v511_v51 = vmax.f32 %v436_v44, 0.0  ;;  %482 = vmatmul.f32.gmra.mxu0 %v1443_v43 }
  0xfd   : > { %599 = vmatmul.f32.gmra.mxu1 %v511_v51 }
 0x100   : > { %v438_v56 = vpop.f32.mrf.mxu0 }
 0x101   : > { %v439_v59 = vadd.f32 %v1378_v48, %v438_v56 }
 0x103   : > { %v512_v61 = vmax.f32 %v439_v59, 0.0  ;;  %485 = vmatmul.f32.gmra.mxu0 %v1460_v57 }
 0x105   : > { %602 = vmatmul.f32.gmra.mxu1 %v512_v61 }
 0x108   : > { %v441_v3 = vpop.f32.mrf.mxu0 }
 0x109   : > { %v442_v5 = vadd.f32 %v1378_v48, %v441_v3 }
 0x10b   : > { %v513_v8 = vmax.f32 %v442_v5, 0.0  ;;  %488 = vmatmul.f32.gmra.mxu0 %v1477_v4 }
 0x10d   : > { %605 = vmatmul.f32.gmra.mxu1 %v513_v8 }
 0x110   : > { %v444_v13 = vpop.f32.mrf.mxu0 }
 0x111   : > { %v445_v25 = vadd.f32 %v1378_v48, %v444_v13 }
 0x113   : > { %v514_v26 = vmax.f32 %v445_v25, 0.0  ;;  %491 = vmatmul.f32.gmra.mxu0 %v1494_v15 }
 0x115   : > { %608 = vmatmul.f32.gmra.mxu1 %v514_v26 }
 0x118   : > { %v447_v29 = vpop.f32.mrf.mxu0 }
 0x119   : > { %v448_v31 = vadd.f32 %v1378_v48, %v447_v29 }
 0x11b   : > { %v515_v34 = vmax.f32 %v448_v31, 0.0  ;;  %494 = vmatmul.f32.gmra.mxu0 %v1499_v30 }
 0x11d   : > { %611 = vmatmul.f32.gmra.mxu1 %v515_v34 }
 0x120   : > { %v450_v35 = vpop.f32.mrf.mxu0 }
 0x121   : > { %v451_v37 = vadd.f32 %v1378_v48, %v450_v35 }
 0x123   : > { %v516_v39 = vmax.f32 %v451_v37, 0.0  ;;  %497 = vmatmul.f32.gmra.mxu0 %v1504_v36 }
 0x125   : > { %614 = vmatmul.f32.gmra.mxu1 %v516_v39 }
 0x128   : > { %v453_v41 = vpop.f32.mrf.mxu0 }
 0x129   : > { %v454_v44 = vadd.f32 %v1378_v48, %v453_v41 }
 0x12a   : > { %v570_v49 = vpop.f32.mrf.mxu1 }
 0x12b   : > { %v517_v51 = vmax.f32 %v454_v44, 0.0  ;;  %v571_v52 = vadd.f32 %v1511_v40, %v570_v49 }
 0x12d   : > { %617 = vmatmul.f32.gmra.mxu1 %v517_v51  ;;  %v666_v53 = vadd.f32 %v571_v52, %v1264_v16 }
 0x12f   : > { %v698_v55 = vmax.f32 %v666_v53, 0.0 }
 0x130   : > { %v456_v56 = vpop.f32.mrf.mxu0 }
 0x131   : > { %v457_v59 = vadd.f32 %v1378_v48, %v456_v56  ;;  %766 = vmatmul.f32.vlgmr.msra.gmra.mxu2 %v698_v55 }
 0x132   : > { %v573_v60 = vpop.f32.mrf.mxu1 }
 0x133   : > { %v518_v61 = vmax.f32 %v457_v59, 0.0  ;;  %v574_v63 = vadd.f32 %v1511_v40, %v573_v60 }
 0x135   : > { %620 = vmatmul.f32.gmra.mxu1 %v518_v61  ;;  %v667_v0 = vadd.f32 %v574_v63, %v1268_v17 }
 0x137   : > { %v699_v1 = vmax.f32 %v667_v0, 0.0 }
 0x138   : > { %v459_v3 = vpop.f32.mrf.mxu0 }
 0x139   : > { %v460_v5 = vadd.f32 %v1378_v48, %v459_v3  ;;  %769 = vmatmul.f32.gmra.mxu2 %v699_v1 }
 0x13a   : > { %v576_v7 = vpop.f32.mrf.mxu1 }
 0x13b   : > { %v519_v8 = vmax.f32 %v460_v5, 0.0  ;;  %v577_v16 = vadd.f32 %v1511_v40, %v576_v7 }
 0x13d   : > { %623 = vmatmul.f32.gmra.mxu1 %v519_v8  ;;  %v668_v9 = vadd.f32 %v577_v16, %v1272_v18 }
 0x13f   : > { %v700_v11 = vmax.f32 %v668_v9, 0.0 }
 0x140   : > { %v462_v12 = vpop.f32.mrf.mxu0 }
 0x141   : > { %v463_v13 = vadd.f32 %v1378_v48, %v462_v12  ;;  %772 = vmatmul.f32.gmra.mxu2 %v700_v11 }
 0x142   : > { %v579_v25 = vpop.f32.mrf.mxu1 }
 0x143   : > { %v520_v26 = vmax.f32 %v463_v13, 0.0  ;;  %v580_v17 = vadd.f32 %v1511_v40, %v579_v25 }
 0x145   : > { %626 = vmatmul.f32.gmra.mxu1 %v520_v26  ;;  %v669_v29 = vadd.f32 %v580_v17, %v1276_v19 }
 0x147   : > { %v701_v31 = vmax.f32 %v669_v29, 0.0 }
 0x148   : > { %v465_v34 = vpop.f32.mrf.mxu0 }
 0x149   : > { %v466_v35 = vadd.f32 %v1378_v48, %v465_v34  ;;  %775 = vmatmul.f32.gmra.mxu2 %v701_v31 }
 0x14a   : > { %v582_v37 = vpop.f32.mrf.mxu1 }
 0x14b   : > { %v521_v39 = vmax.f32 %v466_v35, 0.0  ;;  %v583_v18 = vadd.f32 %v1511_v40, %v582_v37 }
 0x14d   : > { %629 = vmatmul.f32.gmra.mxu1 %v521_v39  ;;  %v670_v41 = vadd.f32 %v583_v18, %v1280_v20 }
 0x14f   : > { %v702_v44 = vmax.f32 %v670_v41, 0.0 }
 0x150   : > { %v468_v49 = vpop.f32.mrf.mxu0 }
 0x151   : > { %v469_v51 = vadd.f32 %v1378_v48, %v468_v49  ;;  %778 = vmatmul.f32.gmra.mxu2 %v702_v44 }
 0x152   : > { %v585_v52 = vpop.f32.mrf.mxu1 }
 0x153   : > { %v522_v53 = vmax.f32 %v469_v51, 0.0  ;;  %v586_v19 = vadd.f32 %v1511_v40, %v585_v52  ;;  %v909_v52 = vld [vmem:[%s1764_s7 + $0x70] sm:$0xff] }
 0x155   : > { %632 = vmatmul.f32.gmra.mxu1 %v522_v53  ;;  %v671_v55 = vadd.f32 %v586_v19, %v1284_v21  ;;  %v908_v53 = vld [vmem:[%s1764_s7 + $0x68] sm:$0xff] }
 0x157   : > { %v703_v56 = vmax.f32 %v671_v55, 0.0  ;;  %v907_v55 = vld [vmem:[%s1764_s7 + $0x60] sm:$0xff] }
 0x158   : > { %v471_v59 = vpop.f32.mrf.mxu0 }
 0x159   : > { %v472_v60 = vadd.f32 %v1378_v48, %v471_v59  ;;  %781 = vmatmul.f32.gmra.mxu2 %v703_v56 }
 0x15a   : > { %v588_v61 = vpop.f32.mrf.mxu1 }
 0x15b   : > { %v523_v63 = vmax.f32 %v472_v60, 0.0  ;;  %v589_v20 = vadd.f32 %v1511_v40, %v588_v61  ;;  %v906_v60 = vld [vmem:[%s1764_s7 + $0x58] sm:$0xff] }
 0x15d   : > { %635 = vmatmul.f32.gmra.mxu1 %v523_v63  ;;  %v672_v0 = vadd.f32 %v589_v20, %v1288_v22  ;;  %v905_v20 = vld [vmem:[%s1764_s7 + $0x50] sm:$0xff] }
 0x15f   : > { %v704_v1 = vmax.f32 %v672_v0, 0.0 }
 0x160   : > { %v474_v3 = vpop.f32.mrf.mxu0 }
 0x161   : > { %v475_v5 = vadd.f32 %v1378_v48, %v474_v3  ;;  %784 = vmatmul.f32.gmra.mxu2 %v704_v1  ;;  %v904_v1 = vld [vmem:[%s1764_s7 + $0x48] sm:$0xff]  ;;  %v903_v3 = vld [vmem:[%s1764_s7 + $0x40] sm:$0xff] }
 0x162   : > { %v591_v7 = vpop.f32.mrf.mxu1 }
 0x163   : > { %v524_v8 = vmax.f32 %v475_v5, 0.0  ;;  %v592_v21 = vadd.f32 %v1511_v40, %v591_v7 }
 0x165   : > { %638 = vmatmul.f32.gmra.mxu1 %v524_v8  ;;  %v673_v16 = vadd.f32 %v592_v21, %v1292_v23  ;;  %v902_v21 = vld [vmem:[%s1764_s7 + $0x38] sm:$0xff] }
 0x167   : > { %v705_v9 = vmax.f32 %v673_v16, 0.0 }
 0x168   : > { %v477_v11 = vpop.f32.mrf.mxu0 }
 0x169   : > { %v478_v12 = vadd.f32 %v1378_v48, %v477_v11  ;;  %787 = vmatmul.f32.gmra.mxu2 %v705_v9  ;;  %v901_v11 = vld [vmem:[%s1764_s7 + $0x30] sm:$0xff] }
 0x16a   : > { %v594_v13 = vpop.f32.mrf.mxu1 }
 0x16b   : > { %v525_v25 = vmax.f32 %v478_v12, 0.0  ;;  %v595_v22 = vadd.f32 %v1511_v40, %v594_v13  ;;  %v900_v12 = vld [vmem:[%s1764_s7 + $0x28] sm:$0xff] }
 0x16d   : > { %641 = vmatmul.f32.gmra.mxu1 %v525_v25  ;;  %v674_v26 = vadd.f32 %v595_v22, %v1296_v24  ;;  %v910_v24 = vld [vmem:[%s1764_s7 + $0x78] sm:$0xff]  ;;  %v899_v25 = vld [vmem:[%s1764_s7 + $0x20] sm:$0xff] }
 0x16e   : > { %915 = vmatpush.msra.mxu3 %v910_v24 }
 0x16f   : > { %v706_v17 = vmax.f32 %v674_v26, 0.0 }
 0x170   : > { %v480_v29 = vpop.f32.mrf.mxu0  ;;  %916 = vmatpush.msra.mxu3 %v909_v52 }
 0x171   : > { %v481_v31 = vadd.f32 %v1378_v48, %v480_v29  ;;  %790 = vmatmul.f32.gmra.mxu2 %v706_v17  ;;  %v898_v29 = vld [vmem:[%s1764_s7 + $0x18] sm:$0xff] }
 0x172   : > { %v597_v34 = vpop.f32.mrf.mxu1  ;;  %917 = vmatpush.msra.mxu3 %v908_v53 }
 0x173   : > { %v526_v35 = vmax.f32 %v481_v31, 0.0  ;;  %v598_v23 = vadd.f32 %v1511_v40, %v597_v34 }
 0x174   : > { %918 = vmatpush.msra.mxu3 %v907_v55 }
 0x175   : > { %644 = vmatmul.f32.gmra.mxu1 %v526_v35  ;;  %v675_v37 = vadd.f32 %v598_v23, %v1309_v28  ;;  %v897_v35 = vld [vmem:[%s1764_s7 + $0x10] sm:$0xff] }
 0x176   : > { %919 = vmatpush.msra.mxu3 %v906_v60 }
 0x177   : > { %v707_v39 = vmax.f32 %v675_v37, 0.0  ;;  %v896_v37 = vld [vmem:[%s1764_s7 + $0x8] sm:$0xff] }
 0x178   : > { %v483_v18 = vpop.f32.mrf.mxu0  ;;  %920 = vmatpush.msra.mxu3 %v905_v20 }
 0x179   : > { %v484_v41 = vadd.f32 %v1378_v48, %v483_v18  ;;  %793 = vmatmul.f32.gmra.mxu2 %v707_v39  ;;  %v895_v39 = vld [vmem:[%s1764_s7] sm:$0xff] }
 0x17a   : > { %v600_v44 = vpop.f32.mrf.mxu1  ;;  %921 = vmatpush.msra.mxu3 %v904_v1 }
 0x17b   : > { %v527_v49 = vmax.f32 %v484_v41, 0.0  ;;  %v601_v51 = vadd.f32 %v1511_v40, %v600_v44 }
 0x17c   : > { %922 = vmatpush.msra.mxu3 %v903_v3 }
 0x17d   : > { %647 = vmatmul.f32.gmra.mxu1 %v527_v49  ;;  %v676_v28 = vadd.f32 %v601_v51, %v1325_v33 }
 0x17e   : > { %923 = vmatpush.msra.mxu3 %v902_v21 }
 0x17f   : > { %v708_v19 = vmax.f32 %v676_v28, 0.0 }
 0x180   : > { %v486_v56 = vpop.f32.mrf.mxu0  ;;  %924 = vmatpush.msra.mxu3 %v901_v11 }
 0x181   : > { %v487_v59 = vadd.f32 %v1378_v48, %v486_v56  ;;  %796 = vmatmul.f32.gmra.mxu2 %v708_v19 }
 0x182   : > { %v603_v33 = vpop.f32.mrf.mxu1  ;;  %925 = vmatpush.msra.mxu3 %v900_v12 }
 0x183   : > { %v528_v61 = vmax.f32 %v487_v59, 0.0  ;;  %v604_v63 = vadd.f32 %v1511_v40, %v603_v33 }
 0x184   : > { %926 = vmatpush.msra.mxu3 %v899_v25 }
 0x185   : > { %650 = vmatmul.f32.gmra.mxu1 %v528_v61  ;;  %v677_v0 = vadd.f32 %v604_v63, %v1341_v38 }
 0x186   : > { %927 = vmatpush.msra.mxu3 %v898_v29 }
 0x187   : > { %v709_v5 = vmax.f32 %v677_v0, 0.0 }
 0x188   : > { %v489_v7 = vpop.f32.mrf.mxu0  ;;  %928 = vmatpush.msra.mxu3 %v897_v35 }
 0x189   : > { %v490_v8 = vadd.f32 %v1378_v48, %v489_v7  ;;  %799 = vmatmul.f32.gmra.mxu2 %v709_v5 }
 0x18a   : > { %v606_v38 = vpop.f32.mrf.mxu1  ;;  %929 = vmatpush.msra.mxu3 %v896_v37 }
 0x18b   : > { %v529_v16 = vmax.f32 %v490_v8, 0.0  ;;  %v607_v9 = vadd.f32 %v1511_v40, %v606_v38 }
 0x18c   : > { %930 = vmatpush.msra.mxu3 %v895_v39 }
 0x18d   : > { %653 = vmatmul.f32.gmra.mxu1 %v529_v16  ;;  %v678_v13 = vadd.f32 %v607_v9, %v1354_v42 }
 0x18f   : > { %v710_v22 = vmax.f32 %v678_v13, 0.0 }
 0x190   : > { %v492_v26 = vpop.f32.mrf.mxu0 }
 0x191   : > { %v493_v17 = vadd.f32 %v1378_v48, %v492_v26  ;;  %802 = vmatmul.f32.gmra.mxu2 %v710_v22 }
 0x192   : > { %v609_v31 = vpop.f32.mrf.mxu1 }
 0x193   : > { %v530_v34 = vmax.f32 %v493_v17, 0.0  ;;  %v610_v42 = vadd.f32 %v1511_v40, %v609_v31 }
 0x195   : > { %656 = vmatmul.f32.gmra.mxu1 %v530_v34  ;;  %v679_v23 = vadd.f32 %v610_v42, %v1364_v45 }
 0x197   : > { %v711_v18 = vmax.f32 %v679_v23, 0.0 }
 0x198   : > { %v495_v41 = vpop.f32.mrf.mxu0 }
 0x199   : > { %v496_v24 = vadd.f32 %v1378_v48, %v495_v41  ;;  %805 = vmatmul.f32.gmra.mxu2 %v711_v18 }
 0x19a   : > { %v612_v44 = vpop.f32.mrf.mxu1 }
 0x19b   : > { %v531_v49 = vmax.f32 %v496_v24, 0.0  ;;  %v613_v51 = vadd.f32 %v1511_v40, %v612_v44 }
 0x19d   : > { %659 = vmatmul.f32.gmra.mxu1 %v531_v49  ;;  %v680_v45 = vadd.f32 %v613_v51, %v1368_v46 }
 0x19f   : > { %v712_v52 = vmax.f32 %v680_v45, 0.0 }
 0x1a0   : > { %v498_v28 = vpop.f32.mrf.mxu0 }
 0x1a1   : > { %v499_v53 = vadd.f32 %v1378_v48, %v498_v28  ;;  %808 = vmatmul.f32.gmra.mxu2 %v712_v52  ;;  %v1614_v48 = vld [vmem:[%s1763_s6] ss:$0 sm:$0xff] }
 0x1a2   : > { %v615_v19 = vpop.f32.mrf.mxu1 }
 0x1a3   : > { %v532_v55 = vmax.f32 %v499_v53, 0.0  ;;  %v616_v56 = vadd.f32 %v1511_v40, %v615_v19 }
 0x1a5   : > { %662 = vmatmul.f32.gmra.mxu1 %v532_v55  ;;  %v681_v59 = vadd.f32 %v616_v56, %v1372_v47 }
 0x1a7   : > { %v713_v60 = vmax.f32 %v681_v59, 0.0 }
 0x1a9   : > { %811 = vmatmul.f32.gmra.mxu2 %v713_v60 }
 0x1aa   : > { %v618_v33 = vpop.f32.mrf.mxu1 }
 0x1ab   : > { %v619_v61 = vadd.f32 %v1511_v40, %v618_v33 }
 0x1ad   : > { %v682_v63 = vadd.f32 %v619_v61, %v1381_v50 }
 0x1af   : > { %v714_v46 = vmax.f32 %v682_v63, 0.0 }
 0x1b1   : > { %814 = vmatmul.f32.gmra.mxu2 %v714_v46 }
 0x1b2   : > { %v621_v20 = vpop.f32.mrf.mxu1 }
 0x1b3   : > { %v622_v0 = vadd.f32 %v1511_v40, %v621_v20 }
 0x1b4   : > { %v767_v1 = vpop.f32.mrf.mxu2 }
 0x1b5   : > { %v768_v47 = vadd.f32 %v1614_v48, %v767_v1  ;;  %v683_v3 = vadd.f32 %v622_v0, %v1386_v54 }
 0x1b7   : > { %v715_v5 = vmax.f32 %v683_v3, 0.0  ;;  %v863_v7 = vmax.f32 %v768_v47, 0.0 }
 0x1b9   : > { %817 = vmatmul.f32.gmra.mxu2 %v715_v5  ;;  %931 = vmatmul.f32.vlgmr.msra.gmra.mxu3 %v863_v7 }
 0x1ba   : > { %v624_v50 = vpop.f32.mrf.mxu1 }
 0x1bb   : > { %v625_v8 = vadd.f32 %v1511_v40, %v624_v50 }
 0x1bc   : > { %v770_v21 = vpop.f32.mrf.mxu2 }
 0x1bd   : > { %v771_v38 = vadd.f32 %v1614_v48, %v770_v21  ;;  %v684_v16 = vadd.f32 %v625_v8, %v1391_v58 }
 0x1bf   : > { %v716_v9 = vmax.f32 %v684_v16, 0.0  ;;  %v864_v11 = vmax.f32 %v771_v38, 0.0 }
 0x1c1   : > { %820 = vmatmul.f32.gmra.mxu2 %v716_v9  ;;  %934 = vmatmul.f32.gmra.mxu3 %v864_v11 }
 0x1c2   : > { %v627_v12 = vpop.f32.mrf.mxu1 }
 0x1c3   : > { %v628_v13 = vadd.f32 %v1511_v40, %v627_v12 }
 0x1c4   : > { %v773_v54 = vpop.f32.mrf.mxu2 }
 0x1c5   : > { %v774_v25 = vadd.f32 %v1614_v48, %v773_v54  ;;  %v685_v22 = vadd.f32 %v628_v13, %v1396_v62 }
 0x1c7   : > { %v717_v26 = vmax.f32 %v685_v22, 0.0  ;;  %v865_v17 = vmax.f32 %v774_v25, 0.0 }
 0x1c9   : > { %823 = vmatmul.f32.gmra.mxu2 %v717_v26  ;;  %937 = vmatmul.f32.gmra.mxu3 %v865_v17 }
 0x1ca   : > { %v630_v29 = vpop.f32.mrf.mxu1 }
 0x1cb   : > { %v631_v31 = vadd.f32 %v1511_v40, %v630_v29 }
 0x1cc   : > { %v776_v58 = vpop.f32.mrf.mxu2 }
 0x1cd   : > { %v777_v34 = vadd.f32 %v1614_v48, %v776_v58  ;;  %v686_v42 = vadd.f32 %v631_v31, %v1401_v2 }
 0x1cf   : > { %v718_v35 = vmax.f32 %v686_v42, 0.0  ;;  %v866_v23 = vmax.f32 %v777_v34, 0.0 }
 0x1d1   : > { %826 = vmatmul.f32.gmra.mxu2 %v718_v35  ;;  %940 = vmatmul.f32.gmra.mxu3 %v866_v23 }
 0x1d2   : > { %v633_v37 = vpop.f32.mrf.mxu1 }
 0x1d3   : > { %v634_v39 = vadd.f32 %v1511_v40, %v633_v37 }
 0x1d4   : > { %v779_v62 = vpop.f32.mrf.mxu2 }
 0x1d5   : > { %v780_v18 = vadd.f32 %v1614_v48, %v779_v62  ;;  %v687_v41 = vadd.f32 %v634_v39, %v1406_v6 }
 0x1d7   : > { %v719_v24 = vmax.f32 %v687_v41, 0.0  ;;  %v867_v44 = vmax.f32 %v780_v18, 0.0 }
 0x1d9   : > { %829 = vmatmul.f32.gmra.mxu2 %v719_v24  ;;  %943 = vmatmul.f32.gmra.mxu3 %v867_v44 }
 0x1da   : > { %v636_v49 = vpop.f32.mrf.mxu1 }
 0x1db   : > { %v637_v51 = vadd.f32 %v1511_v40, %v636_v49 }
 0x1dc   : > { %v782_v2 = vpop.f32.mrf.mxu2 }
 0x1dd   : > { %v783_v45 = vadd.f32 %v1614_v48, %v782_v2  ;;  %v688_v52 = vadd.f32 %v637_v51, %v1411_v10 }
 0x1df   : > { %v720_v28 = vmax.f32 %v688_v52, 0.0  ;;  %v868_v53 = vmax.f32 %v783_v45, 0.0 }
 0x1e1   : > { %832 = vmatmul.f32.gmra.mxu2 %v720_v28  ;;  %946 = vmatmul.f32.gmra.mxu3 %v868_v53 }
 0x1e2   : > { %v639_v19 = vpop.f32.mrf.mxu1 }
 0x1e3   : > { %v640_v55 = vadd.f32 %v1511_v40, %v639_v19 }
 0x1e4   : > { %v785_v6 = vpop.f32.mrf.mxu2 }
 0x1e5   : > { %v786_v56 = vadd.f32 %v1614_v48, %v785_v6  ;;  %v689_v59 = vadd.f32 %v640_v55, %v1416_v14 }
 0x1e7   : > { %v721_v60 = vmax.f32 %v689_v59, 0.0  ;;  %v869_v33 = vmax.f32 %v786_v56, 0.0 }
 0x1e9   : > { %835 = vmatmul.f32.gmra.mxu2 %v721_v60  ;;  %949 = vmatmul.f32.gmra.mxu3 %v869_v33 }
 0x1ea   : > { %v642_v61 = vpop.f32.mrf.mxu1 }
 0x1eb   : > { %v643_v63 = vadd.f32 %v1511_v40, %v642_v61 }
 0x1ec   : > { %v788_v10 = vpop.f32.mrf.mxu2 }
 0x1ed   : > { %v690_v46 = vadd.f32 %v643_v63, %v1421_v27  ;;  %v789_v20 = vadd.f32 %v1614_v48, %v788_v10 }
 0x1ef   : > { %v722_v0 = vmax.f32 %v690_v46, 0.0  ;;  %v870_v1 = vmax.f32 %v789_v20, 0.0 }
 0x1f1   : > { %838 = vmatmul.f32.gmra.mxu2 %v722_v0  ;;  %952 = vmatmul.f32.gmra.mxu3 %v870_v1 }
 0x1f2   : > { %v645_v47 = vpop.f32.mrf.mxu1 }
 0x1f3   : > { %v646_v3 = vadd.f32 %v1511_v40, %v645_v47 }
 0x1f4   : > { %v791_v14 = vpop.f32.mrf.mxu2 }
 0x1f5   : > { %v691_v5 = vadd.f32 %v646_v3, %v1426_v32  ;;  %v792_v7 = vadd.f32 %v1614_v48, %v791_v14 }
 0x1f7   : > { %v723_v50 = vmax.f32 %v691_v5, 0.0  ;;  %v871_v8 = vmax.f32 %v792_v7, 0.0 }
 0x1f9   : > { %841 = vmatmul.f32.gmra.mxu2 %v723_v50  ;;  %955 = vmatmul.f32.gmra.mxu3 %v871_v8 }
 0x1fa   : > { %v648_v21 = vpop.f32.mrf.mxu1 }
 0x1fb   : > { %v649_v27 = vadd.f32 %v1511_v40, %v648_v21 }
 0x1fc   : > { %v794_v38 = vpop.f32.mrf.mxu2 }
 0x1fd   : > { %v692_v16 = vadd.f32 %v649_v27, %v1443_v43  ;;  %v795_v9 = vadd.f32 %v1614_v48, %v794_v38 }
 0x1ff   : > { %v724_v11 = vmax.f32 %v692_v16, 0.0  ;;  %v872_v12 = vmax.f32 %v795_v9, 0.0 }
 0x201   : > { %844 = vmatmul.f32.gmra.mxu2 %v724_v11  ;;  %958 = vmatmul.f32.gmra.mxu3 %v872_v12 }
 0x202   : > { %v651_v13 = vpop.f32.mrf.mxu1 }
 0x203   : > { %v652_v32 = vadd.f32 %v1511_v40, %v651_v13 }
 0x204   : > { %v797_v54 = vpop.f32.mrf.mxu2 }
 0x205   : > { %v693_v25 = vadd.f32 %v652_v32, %v1460_v57  ;;  %v798_v22 = vadd.f32 %v1614_v48, %v797_v54 }
 0x207   : > { %v725_v26 = vmax.f32 %v693_v25, 0.0  ;;  %v873_v17 = vmax.f32 %v798_v22, 0.0 }
 0x209   : > { %847 = vmatmul.f32.gmra.mxu2 %v725_v26  ;;  %961 = vmatmul.f32.gmra.mxu3 %v873_v17 }
 0x20a   : > { %v654_v29 = vpop.f32.mrf.mxu1 }
 0x20b   : > { %v655_v43 = vadd.f32 %v1511_v40, %v654_v29 }
 0x20c   : > { %v800_v31 = vpop.f32.mrf.mxu2 }
 0x20d   : > { %v694_v58 = vadd.f32 %v655_v43, %v1477_v4  ;;  %v801_v34 = vadd.f32 %v1614_v48, %v800_v31 }
 0x20f   : > { %v726_v42 = vmax.f32 %v694_v58, 0.0  ;;  %v874_v35 = vmax.f32 %v801_v34, 0.0 }
 0x211   : > { %850 = vmatmul.f32.gmra.mxu2 %v726_v42  ;;  %964 = vmatmul.f32.gmra.mxu3 %v874_v35 }
 0x212   : > { %v657_v23 = vpop.f32.mrf.mxu1 }
 0x213   : > { %v658_v57 = vadd.f32 %v1511_v40, %v657_v23 }
 0x214   : > { %v803_v37 = vpop.f32.mrf.mxu2 }
 0x215   : > { %v695_v39 = vadd.f32 %v658_v57, %v1494_v15  ;;  %v804_v62 = vadd.f32 %v1614_v48, %v803_v37 }
 0x217   : > { %v727_v18 = vmax.f32 %v695_v39, 0.0  ;;  %v875_v41 = vmax.f32 %v804_v62, 0.0 }
 0x219   : > { %853 = vmatmul.f32.gmra.mxu2 %v727_v18  ;;  %967 = vmatmul.f32.gmra.mxu3 %v875_v41 }
 0x21a   : > { %v660_v24 = vpop.f32.mrf.mxu1 }
 0x21b   : > { %v661_v4 = vadd.f32 %v1511_v40, %v660_v24 }
 0x21c   : > { %v806_v44 = vpop.f32.mrf.mxu2 }
 0x21d   : > { %v696_v49 = vadd.f32 %v661_v4, %v1499_v30  ;;  %v807_v51 = vadd.f32 %v1614_v48, %v806_v44 }
 0x21f   : > { %v728_v2 = vmax.f32 %v696_v49, 0.0  ;;  %v876_v45 = vmax.f32 %v807_v51, 0.0 }
 0x221   : > { %856 = vmatmul.f32.gmra.mxu2 %v728_v2  ;;  %970 = vmatmul.f32.gmra.mxu3 %v876_v45 }
 0x222   : > { %v663_v52 = vpop.f32.mrf.mxu1 }
 0x223   : > { %v664_v15 = vadd.f32 %v1511_v40, %v663_v52 }
 0x224   : > { %v809_v28 = vpop.f32.mrf.mxu2 }
 0x225   : > { %v697_v53 = vadd.f32 %v664_v15, %v1504_v36  ;;  %v810_v19 = vadd.f32 %v1614_v48, %v809_v28  ;;  %v1666_v36 = vld [vmem:[%s1765_s8] ss:$0 sm:$0xff] }
 0x227   : > { %v729_v55 = vmax.f32 %v697_v53, 0.0  ;;  %v877_v6 = vmax.f32 %v810_v19, 0.0 }
 0x229   : > { %859 = vmatmul.f32.gmra.mxu2 %v729_v55  ;;  %973 = vmatmul.f32.gmra.mxu3 %v877_v6 }
 0x22c   : > { %v812_v30 = vpop.f32.mrf.mxu2 }
 0x22d   : > { %v813_v56 = vadd.f32 %v1614_v48, %v812_v30 }
 0x22f   : > { %v878_v59 = vmax.f32 %v813_v56, 0.0 }
 0x231   : > { %976 = vmatmul.f32.gmra.mxu3 %v878_v59 }
 0x234   : > { %v815_v60 = vpop.f32.mrf.mxu2 }
 0x235   : > { %v816_v33 = vadd.f32 %v1614_v48, %v815_v60 }
 0x237   : > { %v879_v61 = vmax.f32 %v816_v33, 0.0 }
 0x239   : > { %979 = vmatmul.f32.gmra.mxu3 %v879_v61 }
 0x23c   : > { %v818_v40 = vpop.f32.mrf.mxu2  ;;  %v932_v63 = vpop.f32.mrf.mxu3 }
 0x23d   : > { %v819_v10 = vadd.f32 %v1614_v48, %v818_v40  ;;  %v933_v46 = vadd.f32 %v1666_v36, %v932_v63 }
 0x23f   : > { %v880_v20 = vmax.f32 %v819_v10, 0.0  ;;  %1028 = vst [vmem:[%s1673_s11] sm:$0xff] %v933_v46 }
 0x241   : > { %982 = vmatmul.f32.gmra.mxu3 %v880_v20 }
 0x244   : > { %v821_v0 = vpop.f32.mrf.mxu2  ;;  %v935_v1 = vpop.f32.mrf.mxu3 }
 0x245   : > { %v822_v47 = vadd.f32 %v1614_v48, %v821_v0  ;;  %v936_v3 = vadd.f32 %v1666_v36, %v935_v1 }
 0x247   : > { %v881_v14 = vmax.f32 %v822_v47, 0.0  ;;  %1029 = vst [vmem:[%s1673_s11 + $0x8] sm:$0xff] %v936_v3 }
 0x249   : > { %985 = vmatmul.f32.gmra.mxu3 %v881_v14 }
 0x24c   : > { %v824_v5 = vpop.f32.mrf.mxu2  ;;  %v938_v7 = vpop.f32.mrf.mxu3 }
 0x24d   : > { %v825_v50 = vadd.f32 %v1614_v48, %v824_v5  ;;  %v939_v8 = vadd.f32 %v1666_v36, %v938_v7 }
 0x24f   : > { %v882_v21 = vmax.f32 %v825_v50, 0.0  ;;  %1030 = vst [vmem:[%s1673_s11 + $0x10] sm:$0xff] %v939_v8 }
 0x251   : > { %988 = vmatmul.f32.gmra.mxu3 %v882_v21 }
 0x254   : > { %v827_v27 = vpop.f32.mrf.mxu2  ;;  %v941_v38 = vpop.f32.mrf.mxu3 }
 0x255   : > { %v828_v16 = vadd.f32 %v1614_v48, %v827_v27  ;;  %v942_v9 = vadd.f32 %v1666_v36, %v941_v38 }
 0x257   : > { %v883_v11 = vmax.f32 %v828_v16, 0.0  ;;  %1031 = vst [vmem:[%s1673_s11 + $0x18] sm:$0xff] %v942_v9 }
 0x259   : > { %991 = vmatmul.f32.gmra.mxu3 %v883_v11 }
 0x25c   : > { %v830_v12 = vpop.f32.mrf.mxu2  ;;  %v944_v13 = vpop.f32.mrf.mxu3 }
 0x25d   : > { %v831_v32 = vadd.f32 %v1614_v48, %v830_v12  ;;  %v945_v54 = vadd.f32 %v1666_v36, %v944_v13 }
 0x25f   : > { %v884_v25 = vmax.f32 %v831_v32, 0.0  ;;  %1032 = vst [vmem:[%s1673_s11 + $0x20] sm:$0xff] %v945_v54 }
 0x261   : > { %994 = vmatmul.f32.gmra.mxu3 %v884_v25 }
 0x264   : > { %v833_v22 = vpop.f32.mrf.mxu2  ;;  %v947_v26 = vpop.f32.mrf.mxu3 }
 0x265   : > { %v834_v17 = vadd.f32 %v1614_v48, %v833_v22  ;;  %v948_v29 = vadd.f32 %v1666_v36, %v947_v26 }
 0x267   : > { %v885_v43 = vmax.f32 %v834_v17, 0.0  ;;  %1033 = vst [vmem:[%s1673_s11 + $0x28] sm:$0xff] %v948_v29 }
 0x269   : > { %997 = vmatmul.f32.gmra.mxu3 %v885_v43 }
 0x26c   : > { %v836_v31 = vpop.f32.mrf.mxu2  ;;  %v950_v58 = vpop.f32.mrf.mxu3 }
 0x26d   : > { %v837_v34 = vadd.f32 %v1614_v48, %v836_v31  ;;  %v951_v42 = vadd.f32 %v1666_v36, %v950_v58 }
 0x26f   : > { %v886_v35 = vmax.f32 %v837_v34, 0.0  ;;  %1034 = vst [vmem:[%s1673_s11 + $0x30] sm:$0xff] %v951_v42 }
 0x271   : > { %1000 = vmatmul.f32.gmra.mxu3 %v886_v35 }
 0x274   : > { %v839_v23 = vpop.f32.mrf.mxu2  ;;  %v953_v57 = vpop.f32.mrf.mxu3 }
 0x275   : > { %v840_v37 = vadd.f32 %v1614_v48, %v839_v23  ;;  %v954_v39 = vadd.f32 %v1666_v36, %v953_v57 }
 0x277   : > { %v887_v62 = vmax.f32 %v840_v37, 0.0  ;;  %1035 = vst [vmem:[%s1673_s11 + $0x38] sm:$0xff] %v954_v39 }
 0x279   : > { %1003 = vmatmul.f32.gmra.mxu3 %v887_v62 }
 0x27c   : > { %v842_v18 = vpop.f32.mrf.mxu2  ;;  %v956_v41 = vpop.f32.mrf.mxu3 }
 0x27d   : > { %v843_v24 = vadd.f32 %v1614_v48, %v842_v18  ;;  %v957_v4 = vadd.f32 %v1666_v36, %v956_v41 }
 0x27f   : > { %v888_v44 = vmax.f32 %v843_v24, 0.0  ;;  %1036 = vst [vmem:[%s1673_s11 + $0x40] sm:$0xff] %v957_v4 }
 0x281   : > { %1006 = vmatmul.f32.gmra.mxu3 %v888_v44 }
 0x284   : > { %v845_v49 = vpop.f32.mrf.mxu2  ;;  %v959_v51 = vpop.f32.mrf.mxu3 }
 0x285   : > { %v846_v2 = vadd.f32 %v1614_v48, %v845_v49  ;;  %v960_v45 = vadd.f32 %v1666_v36, %v959_v51 }
 0x287   : > { %v889_v52 = vmax.f32 %v846_v2, 0.0  ;;  %1037 = vst [vmem:[%s1673_s11 + $0x48] sm:$0xff] %v960_v45 }
 0x289   : > { %1009 = vmatmul.f32.gmra.mxu3 %v889_v52 }
 0x28c   : > { %v848_v15 = vpop.f32.mrf.mxu2  ;;  %v962_v28 = vpop.f32.mrf.mxu3 }
 0x28d   : > { %v849_v53 = vadd.f32 %v1614_v48, %v848_v15  ;;  %v963_v19 = vadd.f32 %v1666_v36, %v962_v28 }
 0x28f   : > { %v890_v55 = vmax.f32 %v849_v53, 0.0  ;;  %1038 = vst [vmem:[%s1673_s11 + $0x50] sm:$0xff] %v963_v19 }
 0x291   : > { %1012 = vmatmul.f32.gmra.mxu3 %v890_v55 }
 0x294   : > { %v851_v6 = vpop.f32.mrf.mxu2  ;;  %v965_v30 = vpop.f32.mrf.mxu3 }
 0x295   : > { %v852_v56 = vadd.f32 %v1614_v48, %v851_v6  ;;  %v966_v59 = vadd.f32 %v1666_v36, %v965_v30 }
 0x297   : > { %v891_v60 = vmax.f32 %v852_v56, 0.0  ;;  %1039 = vst [vmem:[%s1673_s11 + $0x58] sm:$0xff] %v966_v59 }
 0x299   : > { %1015 = vmatmul.f32.gmra.mxu3 %v891_v60 }
 0x29c   : > { %v854_v33 = vpop.f32.mrf.mxu2  ;;  %v968_v61 = vpop.f32.mrf.mxu3 }
 0x29d   : > { %v855_v40 = vadd.f32 %v1614_v48, %v854_v33  ;;  %v969_v63 = vadd.f32 %v1666_v36, %v968_v61 }
 0x29f   : > { %v892_v10 = vmax.f32 %v855_v40, 0.0  ;;  %1040 = vst [vmem:[%s1673_s11 + $0x60] sm:$0xff] %v969_v63 }
 0x2a1   : > { %1018 = vmatmul.f32.gmra.mxu3 %v892_v10 }
 0x2a4   : > { %v857_v46 = vpop.f32.mrf.mxu2  ;;  %v971_v20 = vpop.f32.mrf.mxu3 }
 0x2a5   : > { %v858_v0 = vadd.f32 %v1614_v48, %v857_v46  ;;  %v972_v1 = vadd.f32 %v1666_v36, %v971_v20 }
 0x2a7   : > { %v893_v47 = vmax.f32 %v858_v0, 0.0  ;;  %1041 = vst [vmem:[%s1673_s11 + $0x68] sm:$0xff] %v972_v1 }
 0x2a9   : > { %1021 = vmatmul.f32.gmra.mxu3 %v893_v47 }
 0x2ac   : > { %v860_v3 = vpop.f32.mrf.mxu2  ;;  %v974_v14 = vpop.f32.mrf.mxu3 }
 0x2ad   : > { %v861_v5 = vadd.f32 %v1614_v48, %v860_v3  ;;  %v975_v7 = vadd.f32 %v1666_v36, %v974_v14 }
 0x2af   : > { %v894_v50 = vmax.f32 %v861_v5, 0.0  ;;  %1042 = vst [vmem:[%s1673_s11 + $0x70] sm:$0xff] %v975_v7 }
 0x2b1   : > { %1024 = vmatmul.f32.gmra.mxu3 %v894_v50 }
 0x2b4   : > { %v977_v8 = vpop.f32.mrf.mxu3 }
 0x2b5   : > { %v978_v21 = vadd.f32 %v1666_v36, %v977_v8 }
 0x2b7   : > { %1043 = vst [vmem:[%s1673_s11 + $0x78] sm:$0xff] %v978_v21 }
 0x2bc   : > { %v980_v27 = vpop.f32.mrf.mxu3 }
 0x2bd   : > { %v981_v38 = vadd.f32 %v1666_v36, %v980_v27 }
 0x2bf   : > { %1044 = vst [vmem:[%s1673_s11 + $0x80] sm:$0xff] %v981_v38 }
 0x2c4   : > { %v983_v16 = vpop.f32.mrf.mxu3 }
 0x2c5   : > { %v984_v48 = vadd.f32 %v1666_v36, %v983_v16 }
 0x2c7   : > { %1045 = vst [vmem:[%s1673_s11 + $0x88] sm:$0xff] %v984_v48 }
 0x2cc   : > { %v986_v9 = vpop.f32.mrf.mxu3 }
 0x2cd   : > { %v987_v11 = vadd.f32 %v1666_v36, %v986_v9 }
 0x2cf   : > { %1046 = vst [vmem:[%s1673_s11 + $0x90] sm:$0xff] %v987_v11 }
 0x2d4   : > { %v989_v12 = vpop.f32.mrf.mxu3 }
 0x2d5   : > { %v990_v13 = vadd.f32 %v1666_v36, %v989_v12 }
 0x2d7   : > { %1047 = vst [vmem:[%s1673_s11 + $0x98] sm:$0xff] %v990_v13 }
 0x2dc   : > { %v992_v32 = vpop.f32.mrf.mxu3 }
 0x2dd   : > { %v993_v54 = vadd.f32 %v1666_v36, %v992_v32 }
 0x2df   : > { %1048 = vst [vmem:[%s1673_s11 + $0xa0] sm:$0xff] %v993_v54 }
 0x2e4   : > { %v995_v25 = vpop.f32.mrf.mxu3 }
 0x2e5   : > { %v996_v22 = vadd.f32 %v1666_v36, %v995_v25 }
 0x2e7   : > { %1049 = vst [vmem:[%s1673_s11 + $0xa8] sm:$0xff] %v996_v22 }
 0x2ec   : > { %v998_v26 = vpop.f32.mrf.mxu3 }
 0x2ed   : > { %v999_v17 = vadd.f32 %v1666_v36, %v998_v26 }
 0x2ef   : > { %1050 = vst [vmem:[%s1673_s11 + $0xb0] sm:$0xff] %v999_v17 }
 0x2f4   : > { %v1001_v29 = vpop.f32.mrf.mxu3 }
 0x2f5   : > { %v1002_v43 = vadd.f32 %v1666_v36, %v1001_v29 }
 0x2f7   : > { %1051 = vst [vmem:[%s1673_s11 + $0xb8] sm:$0xff] %v1002_v43 }
 0x2fc   : > { %v1004_v31 = vpop.f32.mrf.mxu3 }
 0x2fd   : > { %v1005_v58 = vadd.f32 %v1666_v36, %v1004_v31 }
 0x2ff   : > { %1052 = vst [vmem:[%s1673_s11 + $0xc0] sm:$0xff] %v1005_v58 }
 0x304   : > { %v1007_v34 = vpop.f32.mrf.mxu3 }
 0x305   : > { %v1008_v42 = vadd.f32 %v1666_v36, %v1007_v34 }
 0x307   : > { %1053 = vst [vmem:[%s1673_s11 + $0xc8] sm:$0xff] %v1008_v42 }
 0x30c   : > { %v1010_v35 = vpop.f32.mrf.mxu3 }
 0x30d   : > { %v1011_v23 = vadd.f32 %v1666_v36, %v1010_v35 }
 0x30f   : > { %1054 = vst [vmem:[%s1673_s11 + $0xd0] sm:$0xff] %v1011_v23 }
 0x314   : > { %v1013_v57 = vpop.f32.mrf.mxu3 }
 0x315   : > { %v1014_v37 = vadd.f32 %v1666_v36, %v1013_v57 }
 0x317   : > { %1055 = vst [vmem:[%s1673_s11 + $0xd8] sm:$0xff] %v1014_v37 }
 0x31c   : > { %v1016_v39 = vpop.f32.mrf.mxu3 }
 0x31d   : > { %v1017_v62 = vadd.f32 %v1666_v36, %v1016_v39 }
 0x31f   : > { %1056 = vst [vmem:[%s1673_s11 + $0xe0] sm:$0xff] %v1017_v62 }
 0x324   : > { %v1019_v18 = vpop.f32.mrf.mxu3 }
 0x325   : > { %v1020_v41 = vadd.f32 %v1666_v36, %v1019_v18 }
 0x327   : > { %1057 = vst [vmem:[%s1673_s11 + $0xe8] sm:$0xff] %v1020_v41 }
 0x32c   : > { %v1022_v24 = vpop.f32.mrf.mxu3 }
 0x32d   : > { %v1023_v4 = vadd.f32 %v1666_v36, %v1022_v24 }
 0x32f   : > { %1058 = vst [vmem:[%s1673_s11 + $0xf0] sm:$0xff] %v1023_v4 }
 0x334   : > { %v1025_v44 = vpop.f32.mrf.mxu3 }
 0x335   : > { %v1026_v49 = vadd.f32 %v1666_v36, %v1025_v44 }
 0x337   : > { %1059 = vst [vmem:[%s1673_s11 + $0xf8] sm:$0xff] %v1026_v49 }
 0x338 PF: > { %s19_s30 = sadd.s32 1, %s1145_s30  }
 0x339   : > { %p16_p4 = scmp.ge.s32.totalorder %s19_s30, 6  }
 0x33b   :  { %18 = sbr.rel (!%p16_p4) target bundleno = 1 (0x1), region = 86 }

</bundles_post_ra>
